<compile_context>
chip_gen: v5e
topology: v5e:2x2
jax: 0.10.0
libtpu: 0.0.40
codegen_flags: <defaults>
</compile_context>

<pallas_src>
import math
import jax
import jax.numpy as jnp
from jax.experimental import pallas as pl
from jax.experimental.pallas import tpu as pltpu

# ---------------- model hyper-parameters (small, consistent with module) ----
INPUT_SHAPE = (3, 8, 8)          # model_options['input_shape']  (C_in, H, W)
HIDDEN_NEURONS = 8               # model_options['hidden_neurons']
PROPORTION = 1.0                 # model_options['proportion']
BATCH = 2

# out_channels exactly as ParamFairCNN.__init__ computes it (from FCNN params)
_fcnn_params = (math.prod(INPUT_SHAPE) * HIDDEN_NEURONS + HIDDEN_NEURONS
                + HIDDEN_NEURONS * 1 + 1)
_req_params = PROPORTION * _fcnn_params
OUT_CHANNELS = int((_req_params - 1) / 5)      # = 310 for the shapes above

C_BLOCK = 128                                  # channel block (sublane) size


# --------------------------------------------------------------------------
# One-time parameter setup (NOT in the per-call hot path).
# --------------------------------------------------------------------------
def prepare_params(w_conv, b_conv, w_fc, b_fc):
    """Pack all vector parameters into one lane-padded VMEM array.

    w_conv: (C, Cin)  -- PyTorch Conv2d(3, C, 1).weight squeezed
    b_conv: (C,)
    w_fc  : (1, C)    -- PyTorch Linear(C, 1).weight
    b_fc  : (1,)
    Returns (packed (C_pad, 8) f32, b_fc (1,) f32).
    Padded channels have zero conv weight, zero conv bias and zero fc weight,
    so they contribute exactly 0 through ReLU / pooling / fc.
    """
    C, Cin = w_conv.shape
    c_pad = ((C + C_BLOCK - 1) // C_BLOCK) * C_BLOCK
    p = jnp.zeros((c_pad, 8), jnp.float32)
    p = p.at[:C, :Cin].set(w_conv.astype(jnp.float32))        # cols 0..Cin-1
    p = p.at[:C, Cin].set(b_conv.astype(jnp.float32))         # col  Cin
    p = p.at[:C, Cin + 1].set(w_fc.reshape(C).astype(jnp.float32))  # col Cin+1
    return p, b_fc.reshape(1).astype(jnp.float32)


# --------------------------------------------------------------------------
# Kernel
# --------------------------------------------------------------------------
def _make_kernel(n_batch, c_in, hw, c_pad):
    n_blocks = c_pad // C_BLOCK
    inv_hw = 1.0 / float(hw)

    def kernel(x_ref, p_ref, bf_ref, out_ref):
        # x_ref : (N*Cin, HW)  VMEM   NCHW memory order, channel rows / pixel lanes
        # p_ref : (C_pad, 8)   VMEM   cols [wc_0..wc_{Cin-1}, b_conv, w_fc, pad..]
        # bf_ref: (1,)         SMEM   fc bias scalar
        # out   : (N, 1)       VMEM
        x_all = x_ref[...]                                       # (N*Cin, HW)

        # Rearrange the N*Cin channel rows into (Cin, N*HW): sample n's pixels
        # occupy lanes [n*HW, (n+1)*HW).  Tiny cross-lane concat (~1 vreg).
        xr = jnp.concatenate(
            [x_all[n * c_in:(n + 1) * c_in, :] for n in range(n_batch)],
            axis=1)                                              # (Cin, N*HW)

        # Per-pixel fc partials: acc[0, q] = sum_c wf[c] * relu(conv(x)[c, q]).
        acc = jnp.zeros((1, n_batch * hw), jnp.float32)

        for blk in range(n_blocks):                    # static channel blocks
            pb = p_ref[blk * C_BLOCK:(blk + 1) * C_BLOCK, :]     # (C_BLOCK, 8)
            bc = pb[:, c_in:c_in + 1]                            # conv bias col
            wf = pb[:, c_in + 1:c_in + 2]                        # fc weight col

            # 1x1 conv (K=Cin) as broadcast FMAs on the VPU; bias fused into
            # the first term.  (Alternative: jnp.dot(pb[:, :Cin], xr) on MXU.)
            h = xr[0:1, :] * pb[:, 0:1] + bc                     # (C_BLOCK, N*HW)
            for k in range(1, c_in):
                h = h + xr[k:k + 1, :] * pb[:, k:k + 1]
            h = jnp.maximum(h, 0.0)                              # ReLU

            # fc weighting + channel (sublane) reduction in one pass —
            # 'pooled' is never materialized.
            acc = acc + jnp.sum(h * wf, axis=0, keepdims=True)   # (1, N*HW)

        # Per-sample pixel (lane) sums -> avg pool + fc, then bias + sigmoid.
        logits = jnp.concatenate(
            [jnp.sum(acc[:, n * hw:(n + 1) * hw], axis=1, keepdims=True)
             for n in range(n_batch)], axis=0)                   # (N, 1)
        out_ref[...] = jax.nn.sigmoid(logits * inv_hw + bf_ref[0])

    return kernel


# --------------------------------------------------------------------------
# Hot-path forward: one free reshape + one pallas_call.
# --------------------------------------------------------------------------
def param_fair_cnn_forward(x, packed_params, b_fc):
    """x: (N, Cin, H, W) f32.  packed_params: (C_pad, 8) f32.  b_fc: (1,) f32."""
    N, Cin, H, W = x.shape
    HW = H * W
    c_pad = packed_params.shape[0]

    # Contiguous reshape only (no transpose): NCHW -> (N*Cin, HW).
    x_flat = x.reshape(N * Cin, HW)

    kernel = _make_kernel(N, Cin, HW, c_pad)

    # Gridless: whole working set is a few hundred KB (fits VMEM on v5e/v6e/v7x).
    # For large N, add grid=(N // n_per_step,) with dimension_semantics=
    # ("parallel",) and cap the per-step pixel-row tile for v7x's 64 MiB VMEM.
    return pl.pallas_call(
        kernel,
        out_shape=jax.ShapeDtypeStruct((N, 1), jnp.float32),
        in_specs=[
            pl.BlockSpec(memory_space=pltpu.MemorySpace.VMEM),   # x_flat
            pl.BlockSpec(memory_space=pltpu.MemorySpace.VMEM),   # packed params
            pl.BlockSpec(memory_space=pltpu.MemorySpace.SMEM),   # fc bias scalar
        ],
        out_specs=pl.BlockSpec(memory_space=pltpu.MemorySpace.VMEM),
    )(x_flat, packed_params, b_fc)


# --------------------------------------------------------------------------
# Pure-JAX reference and test driver
# --------------------------------------------------------------------------
def _reference(x, w_conv, b_conv, w_fc, b_fc):
    # TODO(synk): activation is a constructor argument in the PyTorch module;
    # ReLU is assumed here (and in the kernel).
    y = jnp.einsum('ck,nkhw->nchw', w_conv, x) + b_conv[None, :, None, None]
    y = jax.nn.relu(y)
    pooled = y.mean(axis=(2, 3))                         # (N, C)
    logits = pooled @ w_fc.T + b_fc[None, :]             # (N, 1)
    return jax.nn.sigmoid(logits)


if __name__ == "__main__":
    key = jax.random.PRNGKey(0)
    kx, kwc, kbc, kwf, kbf = jax.random.split(key, 5)

    Cin, H, W = INPUT_SHAPE
    x = jax.random.normal(kx, (BATCH, Cin, H, W), dtype=jnp.float32)

    # Deterministic parameter init (shapes match nn.Conv2d(3,C,1) / nn.Linear(C,1)).
    bnd_c = 1.0 / math.sqrt(Cin)             # 1x1 kernel fan-in
    w_conv = jax.random.uniform(kwc, (OUT_CHANNELS, Cin), jnp.float32, -bnd_c, bnd_c)
    b_conv = jax.random.uniform(kbc, (OUT_CHANNELS,), jnp.float32, -bnd_c, bnd_c)
    bnd_f = 1.0 / math.sqrt(OUT_CHANNELS)
    w_fc = jax.random.uniform(kwf, (1, OUT_CHANNELS), jnp.float32, -bnd_f, bnd_f)
    b_fc = jax.random.uniform(kbf, (1,), jnp.float32, -bnd_f, bnd_f)

    # One-time parameter setup (outside the hot path).
    packed_params, b_fc_s = prepare_params(w_conv, b_conv, w_fc, b_fc)

    fwd = jax.jit(param_fair_cnn_forward)
    out = fwd(x, packed_params, b_fc_s)
    out = jax.block_until_ready(out)

    ref = _reference(x, w_conv, b_conv, w_fc, b_fc)
    assert out.shape == (BATCH, 1), out.shape
    assert jnp.allclose(out, ref, atol=1e-4, rtol=1e-4), (out, ref)

    print("KERNEL_OK")
</pallas_src>

<mosaic_0001>
module attributes {stable_mosaic.version = 11 : i64} {
  func.func @kernel(%arg0: memref<6x64xf32, #tpu.memory_space<vmem>>, %arg1: memref<384x8xf32, #tpu.memory_space<vmem>>, %arg2: memref<1xf32, #tpu.memory_space<smem>>, %arg3: memref<2x1xf32, #tpu.memory_space<vmem>>) attributes {dimension_semantics = [], scalar_prefetch = 0 : i64, scratch_operands = 0 : i64, tpu.core_type = #tpu.core_type<tc>} {
    %c0 = arith.constant 0 : index
    %c0_0 = arith.constant 0 : index
    %0 = vector.load %arg0[%c0, %c0_0] : memref<6x64xf32, #tpu.memory_space<vmem>>, vector<6x64xf32>
    %1 = vector.extract_strided_slice %0 {offsets = [0, 0], sizes = [3, 64], strides = [1, 1]} : vector<6x64xf32> to vector<3x64xf32>
    %2 = vector.extract_strided_slice %0 {offsets = [3, 0], sizes = [3, 64], strides = [1, 1]} : vector<6x64xf32> to vector<3x64xf32>
    %3 = tpu.concatenate %1, %2 in 1 : vector<3x64xf32>, vector<3x64xf32> -> vector<3x128xf32>
    %cst = arith.constant 0.000000e+00 : f32
    %4 = vector.broadcast %cst : f32 to vector<1x128xf32>
    %c0_1 = arith.constant 0 : index
    %c0_2 = arith.constant 0 : index
    %5 = vector.load %arg1[%c0_1, %c0_2] : memref<384x8xf32, #tpu.memory_space<vmem>>, vector<128x8xf32>
    %6 = vector.extract_strided_slice %5 {offsets = [0, 3], sizes = [128, 1], strides = [1, 1]} : vector<128x8xf32> to vector<128x1xf32>
    %7 = vector.extract_strided_slice %5 {offsets = [0, 4], sizes = [128, 1], strides = [1, 1]} : vector<128x8xf32> to vector<128x1xf32>
    %8 = vector.extract_strided_slice %3 {offsets = [0, 0], sizes = [1, 128], strides = [1, 1]} : vector<3x128xf32> to vector<1x128xf32>
    %9 = vector.extract_strided_slice %5 {offsets = [0, 0], sizes = [128, 1], strides = [1, 1]} : vector<128x8xf32> to vector<128x1xf32>
    %10 = vector.broadcast %8 : vector<1x128xf32> to vector<128x128xf32>
    %11 = vector.broadcast %9 : vector<128x1xf32> to vector<128x128xf32>
    %12 = arith.mulf %10, %11 : vector<128x128xf32>
    %13 = vector.broadcast %6 : vector<128x1xf32> to vector<128x128xf32>
    %14 = arith.addf %12, %13 : vector<128x128xf32>
    %15 = vector.extract_strided_slice %3 {offsets = [1, 0], sizes = [1, 128], strides = [1, 1]} : vector<3x128xf32> to vector<1x128xf32>
    %16 = vector.extract_strided_slice %5 {offsets = [0, 1], sizes = [128, 1], strides = [1, 1]} : vector<128x8xf32> to vector<128x1xf32>
    %17 = vector.broadcast %15 : vector<1x128xf32> to vector<128x128xf32>
    %18 = vector.broadcast %16 : vector<128x1xf32> to vector<128x128xf32>
    %19 = arith.mulf %17, %18 : vector<128x128xf32>
    %20 = arith.addf %14, %19 : vector<128x128xf32>
    %21 = vector.extract_strided_slice %3 {offsets = [2, 0], sizes = [1, 128], strides = [1, 1]} : vector<3x128xf32> to vector<1x128xf32>
    %22 = vector.extract_strided_slice %5 {offsets = [0, 2], sizes = [128, 1], strides = [1, 1]} : vector<128x8xf32> to vector<128x1xf32>
    %23 = vector.broadcast %21 : vector<1x128xf32> to vector<128x128xf32>
    %24 = vector.broadcast %22 : vector<128x1xf32> to vector<128x128xf32>
    %25 = arith.mulf %23, %24 : vector<128x128xf32>
    %26 = arith.addf %20, %25 : vector<128x128xf32>
    %cst_3 = arith.constant 0.000000e+00 : f32
    %27 = vector.broadcast %cst_3 : f32 to vector<128x128xf32>
    %28 = arith.maximumf %26, %27 : vector<128x128xf32>
    %29 = vector.broadcast %7 : vector<128x1xf32> to vector<128x128xf32>
    %30 = arith.mulf %28, %29 : vector<128x128xf32>
    %cst_4 = arith.constant dense<0.000000e+00> : vector<128xf32>
    %31 = vector.multi_reduction <add>, %30, %cst_4 [0] : vector<128x128xf32> to vector<128xf32>
    %32 = vector.shape_cast %31 : vector<128xf32> to vector<1x128xf32>
    %33 = arith.addf %4, %32 : vector<1x128xf32>
    %c128 = arith.constant 128 : index
    %c0_5 = arith.constant 0 : index
    %34 = vector.load %arg1[%c128, %c0_5] : memref<384x8xf32, #tpu.memory_space<vmem>>, vector<128x8xf32>
    %35 = vector.extract_strided_slice %34 {offsets = [0, 3], sizes = [128, 1], strides = [1, 1]} : vector<128x8xf32> to vector<128x1xf32>
    %36 = vector.extract_strided_slice %34 {offsets = [0, 4], sizes = [128, 1], strides = [1, 1]} : vector<128x8xf32> to vector<128x1xf32>
    %37 = vector.extract_strided_slice %3 {offsets = [0, 0], sizes = [1, 128], strides = [1, 1]} : vector<3x128xf32> to vector<1x128xf32>
    %38 = vector.extract_strided_slice %34 {offsets = [0, 0], sizes = [128, 1], strides = [1, 1]} : vector<128x8xf32> to vector<128x1xf32>
    %39 = vector.broadcast %37 : vector<1x128xf32> to vector<128x128xf32>
    %40 = vector.broadcast %38 : vector<128x1xf32> to vector<128x128xf32>
    %41 = arith.mulf %39, %40 : vector<128x128xf32>
    %42 = vector.broadcast %35 : vector<128x1xf32> to vector<128x128xf32>
    %43 = arith.addf %41, %42 : vector<128x128xf32>
    %44 = vector.extract_strided_slice %3 {offsets = [1, 0], sizes = [1, 128], strides = [1, 1]} : vector<3x128xf32> to vector<1x128xf32>
    %45 = vector.extract_strided_slice %34 {offsets = [0, 1], sizes = [128, 1], strides = [1, 1]} : vector<128x8xf32> to vector<128x1xf32>
    %46 = vector.broadcast %44 : vector<1x128xf32> to vector<128x128xf32>
    %47 = vector.broadcast %45 : vector<128x1xf32> to vector<128x128xf32>
    %48 = arith.mulf %46, %47 : vector<128x128xf32>
    %49 = arith.addf %43, %48 : vector<128x128xf32>
    %50 = vector.extract_strided_slice %3 {offsets = [2, 0], sizes = [1, 128], strides = [1, 1]} : vector<3x128xf32> to vector<1x128xf32>
    %51 = vector.extract_strided_slice %34 {offsets = [0, 2], sizes = [128, 1], strides = [1, 1]} : vector<128x8xf32> to vector<128x1xf32>
    %52 = vector.broadcast %50 : vector<1x128xf32> to vector<128x128xf32>
    %53 = vector.broadcast %51 : vector<128x1xf32> to vector<128x128xf32>
    %54 = arith.mulf %52, %53 : vector<128x128xf32>
    %55 = arith.addf %49, %54 : vector<128x128xf32>
    %cst_6 = arith.constant 0.000000e+00 : f32
    %56 = vector.broadcast %cst_6 : f32 to vector<128x128xf32>
    %57 = arith.maximumf %55, %56 : vector<128x128xf32>
    %58 = vector.broadcast %36 : vector<128x1xf32> to vector<128x128xf32>
    %59 = arith.mulf %57, %58 : vector<128x128xf32>
    %cst_7 = arith.constant dense<0.000000e+00> : vector<128xf32>
    %60 = vector.multi_reduction <add>, %59, %cst_7 [0] : vector<128x128xf32> to vector<128xf32>
    %61 = vector.shape_cast %60 : vector<128xf32> to vector<1x128xf32>
    %62 = arith.addf %33, %61 : vector<1x128xf32>
    %c256 = arith.constant 256 : index
    %c0_8 = arith.constant 0 : index
    %63 = vector.load %arg1[%c256, %c0_8] : memref<384x8xf32, #tpu.memory_space<vmem>>, vector<128x8xf32>
    %64 = vector.extract_strided_slice %63 {offsets = [0, 3], sizes = [128, 1], strides = [1, 1]} : vector<128x8xf32> to vector<128x1xf32>
    %65 = vector.extract_strided_slice %63 {offsets = [0, 4], sizes = [128, 1], strides = [1, 1]} : vector<128x8xf32> to vector<128x1xf32>
    %66 = vector.extract_strided_slice %3 {offsets = [0, 0], sizes = [1, 128], strides = [1, 1]} : vector<3x128xf32> to vector<1x128xf32>
    %67 = vector.extract_strided_slice %63 {offsets = [0, 0], sizes = [128, 1], strides = [1, 1]} : vector<128x8xf32> to vector<128x1xf32>
    %68 = vector.broadcast %66 : vector<1x128xf32> to vector<128x128xf32>
    %69 = vector.broadcast %67 : vector<128x1xf32> to vector<128x128xf32>
    %70 = arith.mulf %68, %69 : vector<128x128xf32>
    %71 = vector.broadcast %64 : vector<128x1xf32> to vector<128x128xf32>
    %72 = arith.addf %70, %71 : vector<128x128xf32>
    %73 = vector.extract_strided_slice %3 {offsets = [1, 0], sizes = [1, 128], strides = [1, 1]} : vector<3x128xf32> to vector<1x128xf32>
    %74 = vector.extract_strided_slice %63 {offsets = [0, 1], sizes = [128, 1], strides = [1, 1]} : vector<128x8xf32> to vector<128x1xf32>
    %75 = vector.broadcast %73 : vector<1x128xf32> to vector<128x128xf32>
    %76 = vector.broadcast %74 : vector<128x1xf32> to vector<128x128xf32>
    %77 = arith.mulf %75, %76 : vector<128x128xf32>
    %78 = arith.addf %72, %77 : vector<128x128xf32>
    %79 = vector.extract_strided_slice %3 {offsets = [2, 0], sizes = [1, 128], strides = [1, 1]} : vector<3x128xf32> to vector<1x128xf32>
    %80 = vector.extract_strided_slice %63 {offsets = [0, 2], sizes = [128, 1], strides = [1, 1]} : vector<128x8xf32> to vector<128x1xf32>
    %81 = vector.broadcast %79 : vector<1x128xf32> to vector<128x128xf32>
    %82 = vector.broadcast %80 : vector<128x1xf32> to vector<128x128xf32>
    %83 = arith.mulf %81, %82 : vector<128x128xf32>
    %84 = arith.addf %78, %83 : vector<128x128xf32>
    %cst_9 = arith.constant 0.000000e+00 : f32
    %85 = vector.broadcast %cst_9 : f32 to vector<128x128xf32>
    %86 = arith.maximumf %84, %85 : vector<128x128xf32>
    %87 = vector.broadcast %65 : vector<128x1xf32> to vector<128x128xf32>
    %88 = arith.mulf %86, %87 : vector<128x128xf32>
    %cst_10 = arith.constant dense<0.000000e+00> : vector<128xf32>
    %89 = vector.multi_reduction <add>, %88, %cst_10 [0] : vector<128x128xf32> to vector<128xf32>
    %90 = vector.shape_cast %89 : vector<128xf32> to vector<1x128xf32>
    %91 = arith.addf %62, %90 : vector<1x128xf32>
    %92 = vector.extract_strided_slice %91 {offsets = [0, 0], sizes = [1, 64], strides = [1, 1]} : vector<1x128xf32> to vector<1x64xf32>
    %cst_11 = arith.constant dense<0.000000e+00> : vector<1xf32>
    %93 = vector.multi_reduction <add>, %92, %cst_11 [1] : vector<1x64xf32> to vector<1xf32>
    %94 = vector.shape_cast %93 : vector<1xf32> to vector<1x1xf32>
    %95 = vector.extract_strided_slice %91 {offsets = [0, 64], sizes = [1, 64], strides = [1, 1]} : vector<1x128xf32> to vector<1x64xf32>
    %cst_12 = arith.constant dense<0.000000e+00> : vector<1xf32>
    %96 = vector.multi_reduction <add>, %95, %cst_12 [1] : vector<1x64xf32> to vector<1xf32>
    %97 = vector.shape_cast %96 : vector<1xf32> to vector<1x1xf32>
    %98 = tpu.concatenate %94, %97 in 0 : vector<1x1xf32>, vector<1x1xf32> -> vector<2x1xf32>
    %cst_13 = arith.constant 1.562500e-02 : f32
    %99 = vector.broadcast %cst_13 : f32 to vector<2x1xf32>
    %100 = arith.mulf %98, %99 : vector<2x1xf32>
    %c0_14 = arith.constant 0 : index
    %101 = memref.load %arg2[%c0_14] : memref<1xf32, #tpu.memory_space<smem>>
    %102 = vector.broadcast %101 : f32 to vector<2x1xf32>
    %103 = arith.addf %100, %102 : vector<2x1xf32>
    %104 = arith.negf %103 : vector<2x1xf32>
    %105 = math.exp %104 : vector<2x1xf32>
    %cst_15 = arith.constant 1.000000e+00 : f32
    %106 = vector.broadcast %cst_15 : f32 to vector<2x1xf32>
    %107 = arith.addf %106, %105 : vector<2x1xf32>
    %108 = arith.divf %106, %107 : vector<2x1xf32>
    %c0_16 = arith.constant 0 : index
    %c0_17 = arith.constant 0 : index
    %109 = vector.load %arg3[%c0_16, %c0_17] : memref<2x1xf32, #tpu.memory_space<vmem>>, vector<2x1xf32>
    tpu.vector_store %arg3[%c0_16, %c0_17], %108 {strides = array<i32>} : memref<2x1xf32, #tpu.memory_space<vmem>>, vector<2x1xf32>,
    return
  }
}

</mosaic_0001>

<bundles_post_ra>
// kernel: param_fair_cnn_forward.1
= control target key start
LH: loop header
LB: loop body
LE: loop exit
PB: predicated region body
PF: predicated region fallthrough
CT: control target
= control target key end

     0   :  { %v2996_v0 = vmov 0   ;;  %s1643_s18 = smov 64   ;;  %v2992_v21 = vmov 3   ;;  %v2994_v27 = vmov 1   ;;  %v2990_v43 = vmov 2   ;;  %s2986_s1 = inlined_call_operand.vmem [shape: f32[384,8], index: 1, kind: input, shape index: {}]   ;;  %s2987_s0 = inlined_call_operand.vmem [shape: f32[6,64], index: 0, kind: input, shape index: {}]   ;;  %s2988_s2 = inlined_call_operand.<no memory space> [shape: f32[1], index: 2, kind: input, shape index: {}]   ;;  %s2989_s3 = inlined_call_operand.vmem [shape: f32[2,1], index: 3, kind: output, shape index: {}]  }
   0x1   :  { %1582 = vset.pattern.permute.xlu2 %v2996_v0  ;;  %1581 = vset.pattern.permute.xlu1 %v2996_v0  ;;  %v1673_v1 = vld [vmem:[%s2986_s1 + $0x18] sm:$0xff]  ;;  %v1678_v2 = vld [vmem:[%s2986_s1 + $0x8] sm:$0xff]  ;;  %v1683_v3 = vld [vmem:[%s2987_s0] sm:$0x3f]  ;;  %vm21_vm0 = vcmask 523264   ;;  %vm1542_vm1 = vcmask 1040384  }
   0x2   :  { %57 = vperm.xlu2 %1582, %v1673_v1   ;;  %47 = vperm.xlu1 %1581, %v1678_v2   ;;  %v17_v4 = vrot.slane %v1683_v3, 3  ;;  %v1693_v5 = vld [vmem:[%s2986_s1 + $0x20] sm:$0xff]  ;;  %v1698_v6 = vld [vmem:[%s2986_s1 + $0x10] sm:$0xff]  ;;  %v1716_v9 = vld [vmem:[%s2986_s1 + $0x28] sm:$0xff]  ;;  %vm1567_vm4 = vcmask 1024  }
   0x3   :  { %1580 = vset.pattern.permute.xlu0 %v2996_v0  ;;  %v1703_v7 = vld [vmem:[%s2986_s1] sm:$0xff]  ;;  %v1711_v8 = vld [vmem:[%s2986_s1 + $0x30] sm:$0xff]  ;;  %v1721_v10 = vld [vmem:[%s2986_s1 + $0x38] sm:$0xff] }
   0x4   :  { %18 = vrot.lane.b32.xlu0 %v17_v4, %s1643_s18  ;;  %v1729_v11 = vld [vmem:[%s2986_s1 + $0x48] sm:$0xff]  ;;  %v1734_v12 = vld [vmem:[%s2986_s1 + $0x40] sm:$0xff]  ;;  %v1739_v13 = vld [vmem:[%s2986_s1 + $0x50] sm:$0xff] }
   0x5   :  { %v1747_v14 = vld [vmem:[%s2986_s1 + $0x60] sm:$0xff]  ;;  %v1752_v15 = vld [vmem:[%s2986_s1 + $0x58] sm:$0xff]  ;;  %v1757_v16 = vld [vmem:[%s2986_s1 + $0x68] sm:$0xff] }
   0x6   :  { %v1765_v17 = vld [vmem:[%s2986_s1 + $0x78] sm:$0xff]  ;;  %v1770_v18 = vld [vmem:[%s2986_s1 + $0x70] sm:$0xff]  ;;  %v1775_v19 = vld [vmem:[%s2986_s1 + $0x88] sm:$0xff] }
   0x7   :  { %v1783_v20 = vld [vmem:[%s2986_s1 + $0xb0] sm:$0xff]  ;;  %v1793_v22 = vld [vmem:[%s2986_s1 + $0xc8] sm:$0xff]  ;;  %v1801_v23 = vld [vmem:[%s2986_s1 + $0xe0] sm:$0xff] }
   0x8   :  { %v1809_v24 = vld [vmem:[%s2986_s1 + $0xf8] sm:$0xff]  ;;  %v1817_v25 = vld [vmem:[%s2986_s1 + $0x100] sm:$0xff]  ;;  %v1825_v26 = vld [vmem:[%s2986_s1 + $0x128] sm:$0xff] }
   0x9   :  { %3017 = vst [vmem:[#allocation3_spill] sm:$0xff] %v1817_v25  ;;  %v1836_v29 = vld [vmem:[%s2986_s1 + $0x140] sm:$0xff]  ;;  %v1847_v31 = vld [vmem:[%s2986_s1 + $0x158] sm:$0xff]  ;;  %v1857_v33 = vld [vmem:[%s2986_s1 + $0x170] sm:$0xff] }
   0xa   :  { %62 = vperm.xlu2 %1582, %v1693_v5   ;;  %52 = vperm.xlu1 %1581, %v1698_v6   ;;  %3018 = vst [vmem:[#allocation4_spill] sm:$0xff] %v1825_v26  ;;  %v1919_v53 = vld [vmem:[%s2986_s1 + $0x90] sm:$0xff]  ;;  %v1933_v57 = vld [vmem:[%s2986_s1 + $0xb8] sm:$0xff] }
   0xb   :  { %3020 = vst [vmem:[#allocation6_spill] sm:$0xff] %v1836_v29  ;;  %v1947_v61 = vld [vmem:[%s2986_s1 + $0xd0] sm:$0xff] }
   0xc   :  { %42 = vperm.xlu0 %1580, %v1703_v7   ;;  %3022 = vst [vmem:[#allocation8_spill] sm:$0xff] %v1847_v31 }
   0xd   :  { %3024 = vst [vmem:[#allocation10_spill] sm:$0xff] %v1857_v33 }
  0x12   :  { %72 = vperm.xlu2 %1582, %v1711_v8   ;;  %67 = vperm.xlu1 %1581, %v1716_v9  }
  0x14   :  { %77 = vperm.xlu0 %1580, %v1721_v10  }
  0x1a   :  { %87 = vperm.xlu2 %1582, %v1729_v11   ;;  %82 = vperm.xlu1 %1581, %v1734_v12  }
  0x1c   :  { %92 = vperm.xlu0 %1580, %v1739_v13  }
  0x22   :  { %102 = vperm.xlu2 %1582, %v1747_v14   ;;  %97 = vperm.xlu1 %1581, %v1752_v15  }
  0x24   :  { %107 = vperm.xlu0 %1580, %v1757_v16  }
  0x2a   :  { %117 = vperm.xlu2 %1582, %v1765_v17   ;;  %112 = vperm.xlu1 %1581, %v1770_v18  }
  0x2c   :  { %551 = vperm.xlu0 %1580, %v1775_v19  }
  0x32   :  { %1584 = vset.pattern.permute.xlu2 %v2992_v21  ;;  %1583 = vset.pattern.permute.xlu1 %v2992_v21 }
  0x33   :  { %145 = vperm.xlu2 %1584, %v1698_v6   ;;  %141 = vperm.xlu1 %1583, %v1678_v2  }
  0x34   :  { %576 = vperm.xlu0 %1580, %v1783_v20  }
  0x3b   :  { %153 = vperm.xlu2 %1584, %v1693_v5   ;;  %149 = vperm.xlu1 %1583, %v1673_v1  }
  0x3c   :  { %591 = vperm.xlu0 %1580, %v1793_v22  }
  0x43   :  { %165 = vperm.xlu2 %1584, %v1721_v10   ;;  %161 = vperm.xlu1 %1583, %v1711_v8  }
  0x44   :  { %606 = vperm.xlu0 %1580, %v1801_v23  }
  0x4b   :  { %177 = vperm.xlu2 %1584, %v1739_v13   ;;  %173 = vperm.xlu1 %1583, %v1729_v11  }
  0x4c   :  { %621 = vperm.xlu0 %1580, %v1809_v24  }
  0x53   :  { %189 = vperm.xlu2 %1584, %v1757_v16   ;;  %185 = vperm.xlu1 %1583, %v1747_v14  }
  0x54   :  { %1048 = vperm.xlu0 %1580, %v1817_v25  }
  0x5b   :  { %1585 = vset.pattern.permute.xlu2 %v2994_v27  ;;  %197 = vperm.xlu1 %1583, %v1765_v17  }
  0x5c   :  { %v1829_v28 = vpop.permute.xlu2 %57  ;;  %218 = vperm.xlu2 %1585, %v1703_v7   ;;  %1073 = vperm.xlu0 %1580, %v1825_v26  }
  0x5d   :  { %3019 = vst [vmem:[#allocation5_spill] sm:$0xff] %v1829_v28 }
  0x63   :  { %1586 = vset.pattern.permute.xlu1 %v2994_v27  ;;  %v2998_v27 = vmov 4  }
  0x64   :  { %v1839_v30 = vpop.permute.xlu2 %62  ;;  %226 = vperm.xlu1 %1586, %v1698_v6   ;;  %230 = vperm.xlu2 %1585, %v1673_v1  }
  0x65   :  { %3021 = vst [vmem:[#allocation7_spill] sm:$0xff] %v1839_v30  ;;  %1088 = vperm.xlu0 %1580, %v1836_v29   ;;  %v2221_v30 = vld [vmem:[%s2986_s1 + $0x168] sm:$0xff] }
  0x66   :  { %3100 = vst [vmem:[#allocation83_spill] sm:$0xff] %v2221_v30 }
  0x6c   :  { %v1849_v32 = vpop.permute.xlu2 %72  ;;  %234 = vperm.xlu1 %1586, %v1693_v5   ;;  %238 = vperm.xlu2 %1585, %v1716_v9  }
  0x6d   :  { %3023 = vst [vmem:[#allocation9_spill] sm:$0xff] %v1849_v32  ;;  %1103 = vperm.xlu0 %1580, %v1847_v31  }
  0x74   :  { %v1859_v34 = vpop.permute.xlu2 %87  ;;  %246 = vperm.xlu1 %1586, %v1721_v10   ;;  %v1862_v35 = vpop.permute.xlu1 %47  ;;  %250 = vperm.xlu2 %1585, %v1734_v12  }
  0x75   :  { %3025 = vst [vmem:[#allocation11_spill] sm:$0xff] %v1859_v34  ;;  %1118 = vperm.xlu0 %1580, %v1857_v33  }
  0x76   :  { %v1866_v36 = vpop.permute.xlu0 %18 }
  0x7c   :  { %v1868_v37 = vpop.permute.xlu2 %102  ;;  %258 = vperm.xlu1 %1586, %v1739_v13   ;;  %v1871_v38 = vpop.permute.xlu1 %52  ;;  %262 = vperm.xlu2 %1585, %v1752_v15  }
  0x7d   :  { %3026 = vst [vmem:[#allocation12_spill] sm:$0xff] %v1868_v37  ;;  %1603 = vset.pattern.permute.xlu0 %v2992_v21  ;;  %v2177_v37 = vld [vmem:[%s2986_s1 + $0x110] sm:$0xff] }
  0x7e   :  { %3027 = vst [vmem:[#allocation13_spill] sm:$0xff] %v1871_v38  ;;  %137 = vperm.xlu0 %1603, %v1703_v7   ;;  %v1876_v39 = vpop.permute.xlu0 %42 }
  0x84   :  { %v1878_v40 = vpop.permute.xlu2 %117  ;;  %270 = vperm.xlu1 %1586, %v1757_v16   ;;  %v1881_v41 = vpop.permute.xlu1 %67  ;;  %274 = vperm.xlu2 %1585, %v1770_v18  }
  0x85   :  { %3028 = vst [vmem:[#allocation14_spill] sm:$0xff] %v1878_v40 }
  0x86   :  { %3029 = vst [vmem:[#allocation15_spill] sm:$0xff] %v1881_v41  ;;  %157 = vperm.xlu0 %1603, %v1716_v9   ;;  %v1885_v42 = vpop.permute.xlu0 %77 }
  0x87   :  { %3030 = vst [vmem:[#allocation16_spill] sm:$0xff] %v1885_v42 }
  0x8c   :  { %1587 = vset.pattern.permute.xlu1 %v2990_v43  ;;  %v1888_v44 = vpop.permute.xlu1 %82  ;;  %1588 = vset.pattern.permute.xlu2 %v2990_v43  ;;  %v1961_v43 = vld [vmem:[%s2986_s1 + $0xe8] sm:$0xff] }
  0x8d   :  { %3031 = vst [vmem:[#allocation17_spill] sm:$0xff] %v1888_v44  ;;  %v1891_v45 = vpop.permute.xlu2 %145  ;;  %315 = vperm.xlu1 %1587, %v1703_v7   ;;  %319 = vperm.xlu2 %1588, %v1678_v2   ;;  %v2088_v44 = vld [vmem:[%s2986_s1 + $0xc0] sm:$0xff] }
  0x8e   :  { %3032 = vst [vmem:[#allocation18_spill] sm:$0xff] %v1891_v45  ;;  %169 = vperm.xlu0 %1603, %v1734_v12   ;;  %v1896_v46 = vpop.permute.xlu0 %92 }
  0x8f   :  { %3033 = vst [vmem:[#allocation19_spill] sm:$0xff] %v1896_v46  ;;  %v2053_v46 = vld [vmem:[%s2986_s1 + $0x98] sm:$0xff] }
  0x94   :  { %v1898_v47 = vpop.permute.xlu1 %97 }
  0x95   :  { %3034 = vst [vmem:[#allocation20_spill] sm:$0xff] %v1898_v47  ;;  %v1900_v48 = vpop.permute.xlu2 %153  ;;  %327 = vperm.xlu1 %1587, %v1673_v1   ;;  %331 = vperm.xlu2 %1588, %v1693_v5  }
  0x96   :  { %3035 = vst [vmem:[#allocation21_spill] sm:$0xff] %v1900_v48  ;;  %181 = vperm.xlu0 %1603, %v1752_v15   ;;  %v1905_v49 = vpop.permute.xlu0 %107  ;;  %v2069_v48 = vld [vmem:[%s2986_s1 + $0xa0] sm:$0xff] }
  0x97   :  { %3036 = vst [vmem:[#allocation22_spill] sm:$0xff] %v1905_v49 }
  0x9c   :  { %v1907_v50 = vpop.permute.xlu1 %112 }
  0x9d   :  { %3037 = vst [vmem:[#allocation23_spill] sm:$0xff] %v1907_v50  ;;  %v1909_v51 = vpop.permute.xlu2 %165  ;;  %335 = vperm.xlu1 %1587, %v1716_v9   ;;  %339 = vperm.xlu2 %1588, %v1711_v8   ;;  %v1991_v50 = vld [vmem:[%s2986_s1 + $0x130] sm:$0xff] }
  0x9e   :  { %3038 = vst [vmem:[#allocation24_spill] sm:$0xff] %v1909_v51  ;;  %193 = vperm.xlu0 %1603, %v1770_v18   ;;  %v1914_v52 = vpop.permute.xlu0 %551 }
  0x9f   :  { %3039 = vst [vmem:[#allocation25_spill] sm:$0xff] %v1914_v52 }
  0xa5   :  { %v1921_v54 = vpop.permute.xlu2 %177  ;;  %v1923_v55 = vpop.permute.xlu1 %141  ;;  %347 = vperm.xlu1 %1587, %v1734_v12   ;;  %351 = vperm.xlu2 %1588, %v1729_v11  }
  0xa6   :  { %3040 = vst [vmem:[#allocation26_spill] sm:$0xff] %v1921_v54  ;;  %649 = vperm.xlu0 %1603, %v1919_v53   ;;  %v1928_v56 = vpop.permute.xlu0 %576 }
  0xa7   :  { %3041 = vst [vmem:[#allocation27_spill] sm:$0xff] %v1928_v56  ;;  %v1977_v56 = vld [vmem:[%s2986_s1 + $0x108] sm:$0xff] }
  0xad   :  { %v1935_v58 = vpop.permute.xlu2 %189  ;;  %v1937_v59 = vpop.permute.xlu1 %149  ;;  %359 = vperm.xlu1 %1587, %v1752_v15   ;;  %363 = vperm.xlu2 %1588, %v1747_v14  }
  0xae   :  { %3042 = vst [vmem:[#allocation28_spill] sm:$0xff] %v1935_v58  ;;  %669 = vperm.xlu0 %1603, %v1933_v57   ;;  %v1942_v60 = vpop.permute.xlu0 %591 }
  0xaf   :  { %3043 = vst [vmem:[#allocation29_spill] sm:$0xff] %v1937_v59 }
  0xb0   :  { %3044 = vst [vmem:[#allocation30_spill] sm:$0xff] %v1942_v60 }
  0xb5   :  { %v1949_v62 = vpop.permute.xlu1 %161  ;;  %371 = vperm.xlu1 %1587, %v1770_v18   ;;  %375 = vperm.xlu2 %1588, %v1765_v17  }
  0xb6   :  { %3045 = vst [vmem:[#allocation31_spill] sm:$0xff] %v1949_v62  ;;  %681 = vperm.xlu0 %1603, %v1947_v61   ;;  %v1954_v63 = vpop.permute.xlu2 %218  ;;  %v1956_v4 = vpop.permute.xlu0 %606 }
  0xbd   :  { %v1963_v21 = vpop.permute.xlu1 %173  ;;  %1589 = vset.pattern.permute.xlu1 %v2998_v27  ;;  %1590 = vset.pattern.permute.xlu2 %v2998_v27 }
  0xbe   :  { %3046 = vst [vmem:[#allocation32_spill] sm:$0xff] %v1963_v21  ;;  %693 = vperm.xlu0 %1603, %v1961_v43   ;;  %431 = vperm.xlu1 %1589, %v1678_v2   ;;  %v1969_v0 = vpop.permute.xlu2 %230  ;;  %v1971_v60 = vpop.permute.xlu0 %621  ;;  %v2038_v21 = vld [vmem:[%s2986_s1 + $0x80] sm:$0xff] }
  0xbf   :  { %3047 = vst [vmem:[#allocation33_spill] sm:$0xff] %v1969_v0  ;;  %435 = vperm.xlu2 %1590, %v1698_v6  }
  0xc5   :  { %v1979_v52 = vpop.permute.xlu1 %185 }
  0xc6   :  { %3048 = vst [vmem:[#allocation34_spill] sm:$0xff] %v1979_v52  ;;  %1147 = vperm.xlu0 %1603, %v1977_v56   ;;  %439 = vperm.xlu1 %1589, %v1673_v1   ;;  %v1983_v27 = vpop.permute.xlu2 %238  ;;  %v1985_v58 = vpop.permute.xlu0 %1048 }
  0xc7   :  { %3049 = vst [vmem:[#allocation35_spill] sm:$0xff] %v1983_v27  ;;  %443 = vperm.xlu2 %1590, %v1693_v5   ;;  %v2005_v5 = vld [vmem:[%s2986_s1 + $0x148] sm:$0xff]  ;;  %v3065_v27 = vmov 1  }
  0xc8   :  { %3050 = vst [vmem:[#allocation36_spill] sm:$0xff] %v1985_v58 }
  0xcd   :  { %v1993_v49 = vpop.permute.xlu1 %197 }
  0xce   :  { %3051 = vst [vmem:[#allocation37_spill] sm:$0xff] %v1993_v49  ;;  %1167 = vperm.xlu0 %1603, %v1991_v50   ;;  %451 = vperm.xlu1 %1589, %v1711_v8   ;;  %v1997_v40 = vpop.permute.xlu2 %250  ;;  %v1999_v1 = vpop.permute.xlu0 %1073 }
  0xcf   :  { %3052 = vst [vmem:[#allocation38_spill] sm:$0xff] %v1997_v40  ;;  %455 = vperm.xlu2 %1590, %v1721_v10  }
  0xd0   :  { %3053 = vst [vmem:[#allocation39_spill] sm:$0xff] %v1999_v1  ;;  %v2019_v1 = vld [vmem:[%s2986_s1 + $0x160] sm:$0xff] }
  0xd1   :  { %3057 = vst [vmem:[#allocation43_spill] sm:$0xff] %v2019_v1 }
  0xd6   :  { %1179 = vperm.xlu0 %1603, %v2005_v5   ;;  %v2008_v58 = vpop.permute.xlu1 %226  ;;  %463 = vperm.xlu1 %1589, %v1729_v11   ;;  %v2011_v49 = vpop.permute.xlu2 %262 }
  0xd7   :  { %3054 = vst [vmem:[#allocation40_spill] sm:$0xff] %v2008_v58  ;;  %467 = vperm.xlu2 %1590, %v1739_v13   ;;  %v2014_v54 = vpop.permute.xlu0 %1088 }
  0xd8   :  { %3055 = vst [vmem:[#allocation41_spill] sm:$0xff] %v2011_v49 }
  0xd9   :  { %3056 = vst [vmem:[#allocation42_spill] sm:$0xff] %v2014_v54  ;;  %v2033_v54 = vld [vmem:[%s2986_s1 + $0x178] sm:$0xff] }
  0xda   :  { %3061 = vst [vmem:[#allocation47_spill] sm:$0xff] %v2033_v54 }
  0xde   :  { %1191 = vperm.xlu0 %1603, %v2019_v1   ;;  %v2022_v52 = vpop.permute.xlu1 %234  ;;  %475 = vperm.xlu1 %1589, %v1747_v14   ;;  %v2025_v40 = vpop.permute.xlu2 %274 }
  0xdf   :  { %3058 = vst [vmem:[#allocation44_spill] sm:$0xff] %v2022_v52  ;;  %479 = vperm.xlu2 %1590, %v1757_v16   ;;  %v2028_v49 = vpop.permute.xlu0 %1103 }
  0xe0   :  { %3059 = vst [vmem:[#allocation45_spill] sm:$0xff] %v2025_v40  ;;  %v3063_v40 = vmov 0  }
  0xe1   :  { %3060 = vst [vmem:[#allocation46_spill] sm:$0xff] %v2028_v49 }
  0xe6   :  { %1203 = vperm.xlu0 %1603, %v2033_v54   ;;  %v2041_v51 = vpop.permute.xlu1 %246  ;;  %487 = vperm.xlu1 %1589, %v1765_v17  }
  0xe7   :  { %3062 = vst [vmem:[#allocation48_spill] sm:$0xff] %v2041_v51  ;;  %1591 = vset.pattern.permute.xlu2 %v3063_v40  ;;  %v2045_v47 = vpop.permute.xlu2 %319  ;;  %v2047_v49 = vpop.permute.xlu0 %1118 }
  0xe8   :  { %3064 = vst [vmem:[#allocation49_spill] sm:$0xff] %v2047_v49  ;;  %546 = vperm.xlu2 %1591, %v2038_v21  }
  0xee   :  { %1606 = vset.pattern.permute.xlu0 %v3065_v27  ;;  %v2056_v62 = vpop.permute.xlu1 %258  ;;  %1592 = vset.pattern.permute.xlu1 %v3063_v40 }
  0xef   :  { %3066 = vst [vmem:[#allocation50_spill] sm:$0xff] %v2056_v62  ;;  %222 = vperm.xlu0 %1606, %v1678_v2   ;;  %556 = vperm.xlu1 %1592, %v1919_v53   ;;  %v2061_v51 = vpop.permute.xlu2 %331  ;;  %v2074_v62 = vld [vmem:[%s2986_s1 + $0xa8] sm:$0xff] }
  0xf0   :  { %3067 = vst [vmem:[#allocation51_spill] sm:$0xff] %v2061_v51  ;;  %561 = vperm.xlu2 %1591, %v2053_v46   ;;  %v2064_v49 = vpop.permute.xlu0 %137 }
  0xf6   :  { %v2076_v45 = vpop.permute.xlu1 %270 }
  0xf7   :  { %3068 = vst [vmem:[#allocation52_spill] sm:$0xff] %v2076_v45  ;;  %242 = vperm.xlu0 %1606, %v1711_v8   ;;  %566 = vperm.xlu1 %1592, %v2069_v48   ;;  %v2080_v2 = vpop.permute.xlu2 %339 }
  0xf8   :  { %3069 = vst [vmem:[#allocation53_spill] sm:$0xff] %v2080_v2  ;;  %571 = vperm.xlu2 %1591, %v2074_v62   ;;  %v2083_v51 = vpop.permute.xlu0 %157 }
  0xf9   :  { %3070 = vst [vmem:[#allocation54_spill] sm:$0xff] %v2083_v51  ;;  %v2102_v51 = vld [vmem:[%s2986_s1 + $0xd8] sm:$0xff] }
  0xff   :  { %254 = vperm.xlu0 %1606, %v1729_v11   ;;  %581 = vperm.xlu1 %1592, %v1933_v57   ;;  %v2092_v45 = vpop.permute.xlu1 %315  ;;  %v2094_v8 = vpop.permute.xlu2 %351 }
 0x100   :  { %3071 = vst [vmem:[#allocation55_spill] sm:$0xff] %v2094_v8  ;;  %586 = vperm.xlu2 %1591, %v2088_v44   ;;  %v2097_v2 = vpop.permute.xlu0 %169 }
 0x101   :  { %3072 = vst [vmem:[#allocation56_spill] sm:$0xff] %v2097_v2  ;;  %v2116_v2 = vld [vmem:[%s2986_s1 + $0xf0] sm:$0xff] }
 0x107   :  { %266 = vperm.xlu0 %1606, %v1747_v14   ;;  %596 = vperm.xlu1 %1592, %v1947_v61   ;;  %v2106_v11 = vpop.permute.xlu1 %327  ;;  %v2108_v42 = vpop.permute.xlu2 %363 }
 0x108   :  { %3073 = vst [vmem:[#allocation57_spill] sm:$0xff] %v2106_v11  ;;  %601 = vperm.xlu2 %1591, %v2102_v51   ;;  %v2111_v8 = vpop.permute.xlu0 %181 }
 0x109   :  { %3074 = vst [vmem:[#allocation58_spill] sm:$0xff] %v2108_v42 }
 0x10a   :  { %3075 = vst [vmem:[#allocation59_spill] sm:$0xff] %v2111_v8  ;;  %v3079_v8 = vmov 3  }
 0x10f   :  { %278 = vperm.xlu0 %1606, %v1765_v17   ;;  %611 = vperm.xlu1 %1592, %v1961_v43   ;;  %v2120_v14 = vpop.permute.xlu1 %335  ;;  %v2122_v52 = vpop.permute.xlu2 %375 }
 0x110   :  { %3076 = vst [vmem:[#allocation60_spill] sm:$0xff] %v2120_v14  ;;  %616 = vperm.xlu2 %1591, %v2116_v2   ;;  %v2125_v42 = vpop.permute.xlu0 %193 }
 0x111   :  { %3077 = vst [vmem:[#allocation61_spill] sm:$0xff] %v2122_v52 }
 0x112   :  { %3078 = vst [vmem:[#allocation62_spill] sm:$0xff] %v2125_v42 }
 0x117   :  { %721 = vperm.xlu0 %1606, %v2038_v21   ;;  %1593 = vset.pattern.permute.xlu1 %v3079_v8  ;;  %v2129_v11 = vpop.permute.xlu1 %347 }
 0x118   :  { %3080 = vst [vmem:[#allocation63_spill] sm:$0xff] %v2129_v11  ;;  %1594 = vset.pattern.permute.xlu2 %v3079_v8  ;;  %641 = vperm.xlu1 %1593, %v2038_v21   ;;  %v2133_v17 = vpop.permute.xlu0 %649 }
 0x119   :  { %645 = vperm.xlu2 %1594, %v1775_v19   ;;  %v2136_v14 = vpop.permute.xlu2 %435 }
 0x11a   :  { %3081 = vst [vmem:[#allocation64_spill] sm:$0xff] %v2136_v14 }
 0x11f   :  { %741 = vperm.xlu0 %1606, %v2074_v62   ;;  %v2139_v52 = vpop.permute.xlu1 %359 }
 0x120   :  { %3082 = vst [vmem:[#allocation65_spill] sm:$0xff] %v2139_v52  ;;  %653 = vperm.xlu1 %1593, %v2053_v46   ;;  %v2142_v42 = vpop.permute.xlu0 %669 }
 0x121   :  { %3083 = vst [vmem:[#allocation66_spill] sm:$0xff] %v2142_v42  ;;  %657 = vperm.xlu2 %1594, %v2069_v48   ;;  %v2145_v11 = vpop.permute.xlu2 %443 }
 0x122   :  { %3084 = vst [vmem:[#allocation67_spill] sm:$0xff] %v2145_v11 }
 0x127   :  { %753 = vperm.xlu0 %1606, %v2088_v44   ;;  %v2148_v59 = vpop.permute.xlu1 %371 }
 0x128   :  { %3085 = vst [vmem:[#allocation68_spill] sm:$0xff] %v2148_v59  ;;  %661 = vperm.xlu1 %1593, %v2074_v62   ;;  %v2151_v41 = vpop.permute.xlu0 %681 }
 0x129   :  { %3086 = vst [vmem:[#allocation69_spill] sm:$0xff] %v2151_v41  ;;  %665 = vperm.xlu2 %1594, %v1783_v20   ;;  %v2154_v14 = vpop.permute.xlu2 %455  ;;  %v3108_v41 = vmov 2  }
 0x12a   :  { %3087 = vst [vmem:[#allocation70_spill] sm:$0xff] %v2154_v14 }
 0x12f   :  { %765 = vperm.xlu0 %1606, %v2102_v51  }
 0x130   :  { %673 = vperm.xlu1 %1593, %v2088_v44   ;;  %v2158_v52 = vpop.permute.xlu1 %431  ;;  %v2160_v58 = vpop.permute.xlu0 %693 }
 0x131   :  { %3088 = vst [vmem:[#allocation71_spill] sm:$0xff] %v2160_v58  ;;  %677 = vperm.xlu2 %1594, %v1793_v22   ;;  %v2163_v11 = vpop.permute.xlu2 %467 }
 0x132   :  { %3089 = vst [vmem:[#allocation72_spill] sm:$0xff] %v2163_v11 }
 0x137   :  { %777 = vperm.xlu0 %1606, %v2116_v2  }
 0x138   :  { %685 = vperm.xlu1 %1593, %v2102_v51   ;;  %v2167_v59 = vpop.permute.xlu1 %439  ;;  %v2169_v38 = vpop.permute.xlu0 %1147 }
 0x139   :  { %3090 = vst [vmem:[#allocation73_spill] sm:$0xff] %v2167_v59  ;;  %689 = vperm.xlu2 %1594, %v1801_v23   ;;  %v2172_v14 = vpop.permute.xlu2 %479 }
 0x13a   :  { %3091 = vst [vmem:[#allocation74_spill] sm:$0xff] %v2169_v38 }
 0x13b   :  { %3092 = vst [vmem:[#allocation75_spill] sm:$0xff] %v2172_v14  ;;  %v2191_v14 = vld [vmem:[%s2986_s1 + $0x138] sm:$0xff] }
 0x13f   :  { %1231 = vperm.xlu0 %1606, %v2177_v37  }
 0x140   :  { %697 = vperm.xlu1 %1593, %v2116_v2   ;;  %v2181_v11 = vpop.permute.xlu1 %451  ;;  %v2183_v34 = vpop.permute.xlu0 %1167 }
 0x141   :  { %3093 = vst [vmem:[#allocation76_spill] sm:$0xff] %v2181_v11  ;;  %701 = vperm.xlu2 %1594, %v1809_v24   ;;  %v2207_v11 = vld [vmem:[%s2986_s1 + $0x150] sm:$0xff] }
 0x142   :  { %3094 = vst [vmem:[#allocation77_spill] sm:$0xff] %v2183_v34  ;;  %v2186_v38 = vpop.permute.xlu2 %546 }
 0x143   :  { %3097 = vst [vmem:[#allocation80_spill] sm:$0xff] %v2207_v11 }
 0x147   :  { %1251 = vperm.xlu0 %1606, %v2191_v14  }
 0x148   :  { %1595 = vset.pattern.permute.xlu1 %v3065_v27  ;;  %v2195_v59 = vpop.permute.xlu1 %463  ;;  %v2197_v0 = vpop.permute.xlu0 %1179 }
 0x149   :  { %3095 = vst [vmem:[#allocation78_spill] sm:$0xff] %v2195_v59  ;;  %1596 = vset.pattern.permute.xlu2 %v3065_v27  ;;  %725 = vperm.xlu1 %1595, %v1775_v19  }
 0x14a   :  { %3096 = vst [vmem:[#allocation79_spill] sm:$0xff] %v2197_v0  ;;  %729 = vperm.xlu2 %1596, %v1919_v53   ;;  %v2202_v34 = vpop.permute.xlu2 %561 }
 0x14f   :  { %1263 = vperm.xlu0 %1606, %v2207_v11  }
 0x150   :  { %v2210_v32 = vpop.permute.xlu1 %475  ;;  %v2212_v59 = vpop.permute.xlu0 %1191 }
 0x151   :  { %3098 = vst [vmem:[#allocation81_spill] sm:$0xff] %v2210_v32  ;;  %733 = vperm.xlu1 %1595, %v2053_v46   ;;  %v3103_v32 = vmov 4  }
 0x152   :  { %3099 = vst [vmem:[#allocation82_spill] sm:$0xff] %v2212_v59  ;;  %737 = vperm.xlu2 %1596, %v2069_v48   ;;  %v2216_v0 = vpop.permute.xlu2 %571 }
 0x157   :  { %1275 = vperm.xlu0 %1606, %v2221_v30  }
 0x158   :  { %v2224_v28 = vpop.permute.xlu1 %487  ;;  %v2226_v27 = vpop.permute.xlu0 %1203 }
 0x159   :  { %3101 = vst [vmem:[#allocation84_spill] sm:$0xff] %v2224_v28  ;;  %745 = vperm.xlu1 %1595, %v1783_v20  }
 0x15a   :  { %3102 = vst [vmem:[#allocation85_spill] sm:$0xff] %v2226_v27  ;;  %749 = vperm.xlu2 %1596, %v1933_v57   ;;  %v2230_v59 = vpop.permute.xlu2 %586 }
 0x15f   :  { %1609 = vset.pattern.permute.xlu0 %v3103_v32 }
 0x160   :  { %427 = vperm.xlu0 %1609, %v1703_v7  }
 0x161   :  { %v2234_v33 = vpop.permute.xlu0 %222  ;;  %757 = vperm.xlu1 %1595, %v1793_v22   ;;  %v2237_v31 = vpop.permute.xlu1 %556 }
 0x162   :  { %761 = vperm.xlu2 %1596, %v1947_v61   ;;  %v2240_v28 = vpop.permute.xlu2 %601 }
 0x168   :  { %447 = vperm.xlu0 %1609, %v1716_v9  }
 0x169   :  { %v2243_v27 = vpop.permute.xlu0 %242  ;;  %769 = vperm.xlu1 %1595, %v1801_v23   ;;  %v2246_v29 = vpop.permute.xlu1 %566 }
 0x16a   :  { %3104 = vst [vmem:[#allocation86_spill] sm:$0xff] %v2243_v27  ;;  %773 = vperm.xlu2 %1596, %v1961_v43   ;;  %v617_v7 = vpop.permute.xlu2 %616 }
 0x16b   :  { %3105 = vst [vmem:[#allocation87_spill] sm:$0xff] %v2246_v29 }
 0x170   :  { %459 = vperm.xlu0 %1609, %v1734_v12  }
 0x171   :  { %v2250_v26 = vpop.permute.xlu0 %254  ;;  %781 = vperm.xlu1 %1595, %v1809_v24   ;;  %v2253_v58 = vpop.permute.xlu1 %581 }
 0x172   :  { %3106 = vst [vmem:[#allocation88_spill] sm:$0xff] %v2250_v26  ;;  %1597 = vset.pattern.permute.xlu2 %v3108_v41 }
 0x173   :  { %3107 = vst [vmem:[#allocation89_spill] sm:$0xff] %v2253_v58  ;;  %817 = vperm.xlu2 %1597, %v2038_v21   ;;  %v2257_v9 = vpop.permute.xlu2 %645 }
 0x174   :  { %3109 = vst [vmem:[#allocation90_spill] sm:$0xff] %v2257_v9 }
 0x178   :  { %471 = vperm.xlu0 %1609, %v1752_v15  }
 0x179   :  { %v2260_v27 = vpop.permute.xlu0 %266  ;;  %1598 = vset.pattern.permute.xlu1 %v3108_v41  ;;  %v2263_v8 = vpop.permute.xlu1 %596 }
 0x17a   :  { %3110 = vst [vmem:[#allocation91_spill] sm:$0xff] %v2260_v27  ;;  %825 = vperm.xlu1 %1598, %v1919_v53  }
 0x17b   :  { %3111 = vst [vmem:[#allocation92_spill] sm:$0xff] %v2263_v8  ;;  %829 = vperm.xlu2 %1597, %v2053_v46   ;;  %v2267_v12 = vpop.permute.xlu2 %657 }
 0x17c   :  { %3112 = vst [vmem:[#allocation93_spill] sm:$0xff] %v2267_v12 }
 0x180   :  { %483 = vperm.xlu0 %1609, %v1770_v18  }
 0x181   :  { %v2270_v26 = vpop.permute.xlu0 %278  ;;  %v2272_v54 = vpop.permute.xlu1 %611 }
 0x182   :  { %3113 = vst [vmem:[#allocation94_spill] sm:$0xff] %v2270_v26  ;;  %833 = vperm.xlu1 %1598, %v2069_v48  }
 0x183   :  { %3114 = vst [vmem:[#allocation95_spill] sm:$0xff] %v2272_v54  ;;  %837 = vperm.xlu2 %1597, %v2074_v62   ;;  %v2276_v15 = vpop.permute.xlu2 %665 }
 0x184   :  { %3115 = vst [vmem:[#allocation96_spill] sm:$0xff] %v2276_v15 }
 0x188   :  { %937 = vperm.xlu0 %1609, %v1919_v53  }
 0x189   :  { %v2279_v9 = vpop.permute.xlu0 %721 }
 0x18a   :  { %845 = vperm.xlu1 %1598, %v1933_v57   ;;  %v2282_v27 = vpop.permute.xlu1 %641 }
 0x18b   :  { %849 = vperm.xlu2 %1597, %v2088_v44   ;;  %v2285_v18 = vpop.permute.xlu2 %677 }
 0x18c   :  { %3116 = vst [vmem:[#allocation97_spill] sm:$0xff] %v2285_v18 }
 0x190   :  { %957 = vperm.xlu0 %1609, %v1933_v57  }
 0x191   :  { %v2288_v26 = vpop.permute.xlu0 %741 }
 0x192   :  { %857 = vperm.xlu1 %1598, %v1947_v61   ;;  %v2291_v54 = vpop.permute.xlu1 %653 }
 0x193   :  { %861 = vperm.xlu2 %1597, %v2102_v51   ;;  %v2294_v53 = vpop.permute.xlu2 %689 }
 0x198   :  { %969 = vperm.xlu0 %1609, %v1947_v61  }
 0x199   :  { %v2297_v15 = vpop.permute.xlu0 %753 }
 0x19a   :  { %869 = vperm.xlu1 %1598, %v1961_v43   ;;  %v2300_v8 = vpop.permute.xlu1 %661 }
 0x19b   :  { %873 = vperm.xlu2 %1597, %v2116_v2   ;;  %v2303_v57 = vpop.permute.xlu2 %701 }
 0x1a0   :  { %981 = vperm.xlu0 %1609, %v1961_v43   ;;  %v22_v43 = vsel %vm21_vm0, %v1683_v3, %v1866_v36 }
 0x1a1   :  { %v2306_v18 = vpop.permute.xlu0 %765  ;;  %v2334_v1 = vperm.slane %v22_v43, 1 }
 0x1a2   :  { %1599 = vset.pattern.permute.xlu1 %v3103_v32  ;;  %v2309_v42 = vpop.permute.xlu1 %673 }
 0x1a3   :  { %1600 = vset.pattern.permute.xlu2 %v3103_v32  ;;  %929 = vperm.xlu1 %1599, %v2038_v21   ;;  %v2329_v21 = vld [vmem:[%s2986_s1 + $0x118] sm:$0xff] }
 0x1a4   :  { %933 = vperm.xlu2 %1600, %v1775_v19   ;;  %v2314_v61 = vpop.permute.xlu2 %729 }
 0x1a8   :  { %1431 = vperm.xlu0 %1609, %v1817_v25   ;;  %v2331_v25 = vperm.slane %v22_v43, 0 }
 0x1a9   :  { %v778_v58 = vpop.permute.xlu0 %777 }
 0x1aa   :  { %v2317_v30 = vpop.permute.xlu1 %685  ;;  %v798_v36 = vmul.f32 %v778_v58, %v2334_v1 }
 0x1ab   :  { %941 = vperm.xlu1 %1599, %v2053_v46   ;;  %v638_v46 = vmul.f32 %v617_v7, %v2331_v25 }
 0x1ac   :  { %945 = vperm.xlu2 %1600, %v2069_v48   ;;  %v2324_v32 = vpop.permute.xlu2 %737 }
 0x1ad   :  { %3117 = vst [vmem:[#allocation98_spill] sm:$0xff] %v2324_v32 }
 0x1b0   :  { %1443 = vperm.xlu0 %1609, %v2329_v21  }
 0x1b1   :  { %v2337_v12 = vpop.permute.xlu0 %1231 }
 0x1b2   :  { %3118 = vst [vmem:[#allocation99_spill] sm:$0xff] %v2337_v12  ;;  %v698_v3 = vpop.permute.xlu1 %697 }
 0x1b3   :  { %v718_v48 = vadd.f32 %v698_v3, %v638_v46  ;;  %949 = vperm.xlu1 %1599, %v2074_v62   ;;  %v121_v46 = vmul.f32 %v1862_v35, %v2331_v25  ;;  %v120_v3 = vmul.f32 %v1876_v39, %v2331_v25  ;;  %v624_v39 = vmul.f32 %v2186_v38, %v2331_v25 }
 0x1b4   :  { %953 = vperm.xlu2 %1600, %v1783_v20   ;;  %v2342_v32 = vpop.permute.xlu2 %749 }
 0x1b5   :  { %v2344_v29 = vadd.f32 %v798_v36, %v718_v48 }
 0x1b8   :  { %1459 = vperm.xlu0 %1609, %v2191_v14  }
 0x1b9   :  { %v2347_v11 = vpop.permute.xlu0 %1251 }
 0x1ba   :  { %3119 = vst [vmem:[#allocation100_spill] sm:$0xff] %v2347_v11  ;;  %v2370_v11 = vperm.slane %v22_v43, 2  ;;  %v704_v43 = vadd.f32 %v2282_v27, %v624_v39 }
 0x1bb   :  { %961 = vperm.xlu1 %1599, %v2088_v44   ;;  %v2350_v7 = vpop.permute.xlu1 %725  ;;  %v282_v44 = vmul.f32 %v2234_v33, %v2334_v1  ;;  %v281_v33 = vmul.f32 %v1954_v63, %v2334_v1  ;;  %v784_v63 = vmul.f32 %v2279_v9, %v2334_v1 }
 0x1bc   :  { %965 = vperm.xlu2 %1600, %v1793_v22   ;;  %v2353_v58 = vpop.permute.xlu2 %761  ;;  %v378_v12 = vmul.f32 %v2092_v45, %v2370_v11 }
 0x1bd   :  { %v800_v45 = vadd.f32 %v784_v63, %v704_v43 }
 0x1c0   :  { %1617 = vset.pattern.permute.xlu0 %v3108_v41 }
 0x1c1   :  { %323 = vperm.xlu0 %1617, %v1698_v6   ;;  %v2357_v62 = vpop.permute.xlu0 %1263  ;;  %v201_v6 = vadd.f32 %v1923_v55, %v121_v46 }
 0x1c2   :  { %3120 = vst [vmem:[#allocation101_spill] sm:$0xff] %v2357_v62  ;;  %v200_v62 = vadd.f32 %v2064_v49, %v120_v3 }
 0x1c3   :  { %973 = vperm.xlu1 %1599, %v2102_v51   ;;  %v734_v36 = vpop.permute.xlu1 %733  ;;  %v298_v35 = vadd.f32 %v282_v44, %v201_v6  ;;  %v379_v51 = vmul.f32 %v2045_v47, %v2370_v11 }
 0x1c4   :  { %977 = vperm.xlu2 %1600, %v1801_v23   ;;  %v2367_v48 = vpop.permute.xlu2 %773  ;;  %v297_v49 = vadd.f32 %v281_v33, %v200_v62  ;;  %v787_v62 = vmul.f32 %v734_v36, %v2334_v1 }
 0x1c5   :  { %v395_v46 = vadd.f32 %v379_v51, %v298_v35 }
 0x1c6   :  { %v394_v3 = vadd.f32 %v378_v12, %v297_v49 }
 0x1c7   :  { %v411_v44 = vmax.f32 %v395_v46, 0.0  ;;  %v2422_v46 = vld [vmem:[%s2986_s1 + $0x120] sm:$0xff] }
 0x1c8   :  { %v410_v27 = vmax.f32 %v394_v3, 0.0 }
 0x1c9   :  { %343 = vperm.xlu0 %1617, %v1721_v10   ;;  %v2382_v55 = vpop.permute.xlu0 %1275  ;;  %v491_v9 = vmul.f32 %v2158_v52, %v411_v44  ;;  %v629_v52 = vmul.f32 %v2216_v0, %v2331_v25  ;;  %v789_v0 = vmul.f32 %v2288_v26, %v2334_v1  ;;  %v639_v26 = vmul.f32 %v1971_v60, %v2331_v25 }
 0x1ca   :  { %3121 = vst [vmem:[#allocation102_spill] sm:$0xff] %v2382_v55  ;;  %v626_v60 = vmul.f32 %v2237_v31, %v2331_v25  ;;  %v3170_v55 = vld [vmem:[#allocation31_spill] sm:$0xff] }
 0x1cb   :  { %985 = vperm.xlu1 %1599, %v2116_v2   ;;  %v2386_v38 = vpop.permute.xlu1 %745  ;;  %v627_v2 = vmul.f32 %v2202_v34, %v2331_v25 }
 0x1cc   :  { %989 = vperm.xlu2 %1600, %v1809_v24  }
 0x1cd   :  { %v818_v47 = vpop.permute.xlu2 %817  ;;  %v707_v33 = vadd.f32 %v2291_v54, %v627_v2  ;;  %v709_v54 = vadd.f32 %v2300_v8, %v629_v52  ;;  %v795_v52 = vmul.f32 %v2306_v18, %v2334_v1  ;;  %v3125_v18 = vld [vmem:[#allocation98_spill] sm:$0xff] }
 0x1ce   :  { %v880_v10 = vmul.f32 %v818_v47, %v2370_v11 }
 0x1cf   :  { %v803_v36 = vadd.f32 %v787_v62, %v707_v33  ;;  %v805_v8 = vadd.f32 %v789_v0, %v709_v54  ;;  %v792_v62 = vmul.f32 %v2297_v15, %v2334_v1  ;;  %v635_v15 = vmul.f32 %v2240_v28, %v2331_v25  ;;  %v3123_v54 = vld [vmem:[#allocation80_spill] sm:$0xff] }
 0x1d0   :  { %v2392_v6 = vadd.f32 %v880_v10, %v800_v45  ;;  %v632_v10 = vmul.f32 %v2230_v59, %v2331_v25 }
 0x1d1   :  { %355 = vperm.xlu0 %1617, %v1739_v13  }
 0x1d2   :  { %v428_v35 = vpop.permute.xlu0 %427 }
 0x1d3   :  { %v490_v39 = vmul.f32 %v428_v35, %v410_v27  ;;  %1601 = vset.pattern.permute.xlu1 %v3063_v40  ;;  %v2400_v12 = vpop.permute.xlu1 %757  ;;  %v719_v35 = vadd.f32 %v2303_v57, %v639_v26  ;;  %v786_v57 = vmul.f32 %v2314_v61, %v2334_v1 }
 0x1d4   :  { %1602 = vset.pattern.permute.xlu2 %v3063_v40  ;;  %1053 = vperm.xlu1 %1601, %v1977_v56   ;;  %v636_v40 = vmul.f32 %v1956_v4, %v2331_v25 }
 0x1d5   :  { %v2405_v13 = vadd.f32 %v491_v9, %v490_v39  ;;  %1058 = vperm.xlu2 %1602, %v2177_v37   ;;  %v830_v34 = vpop.permute.xlu2 %829 }
 0x1d6   :  { %v883_v51 = vmul.f32 %v830_v34, %v2370_v11  ;;  %v716_v47 = vadd.f32 %v2294_v53, %v636_v40  ;;  %v712_v53 = vadd.f32 %v2309_v42, %v632_v10  ;;  %v715_v34 = vadd.f32 %v2317_v30, %v635_v15 }
 0x1d8   :  { %v2411_v43 = vadd.f32 %v883_v51, %v803_v36  ;;  %v808_v59 = vadd.f32 %v792_v62, %v712_v53  ;;  %v706_v51 = vadd.f32 %v2133_v17, %v626_v60  ;;  %v3124_v17 = vld [vmem:[#allocation87_spill] sm:$0xff] }
 0x1d9   :  { %367 = vperm.xlu0 %1617, %v1757_v16  }
 0x1da   :  { %v2417_v49 = vpop.permute.xlu0 %447  ;;  %v802_v28 = vadd.f32 %v786_v57, %v706_v51  ;;  %v3130_v57 = vld [vmem:[#allocation66_spill] sm:$0xff] }
 0x1db   :  { %v770_v63 = vpop.permute.xlu1 %769 }
 0x1dc   :  { %v796_v16 = vmul.f32 %v770_v63, %v2334_v1  ;;  %1063 = vperm.xlu1 %1601, %v2329_v21   ;;  %v811_v63 = vadd.f32 %v795_v52, %v715_v34  ;;  %v3131_v52 = vld [vmem:[#allocation47_spill] sm:$0xff] }
 0x1dd   :  { %1068 = vperm.xlu2 %1602, %v2422_v46   ;;  %v838_v4 = vpop.permute.xlu2 %837 }
 0x1de   :  { %v2430_v3 = vadd.f32 %v796_v16, %v716_v47  ;;  %v885_v45 = vmul.f32 %v838_v4, %v2370_v11  ;;  %v628_v47 = vmul.f32 %v3124_v17, %v2331_v25  ;;  %v788_v16 = vmul.f32 %v3125_v18, %v2334_v1  ;;  %v3126_v4 = vld [vmem:[#allocation93_spill] sm:$0xff] }
 0x1df   :  { %v3135_v18 = vld [vmem:[#allocation69_spill] sm:$0xff] }
 0x1e0   :  { %v2435_v44 = vadd.f32 %v885_v45, %v805_v8  ;;  %v708_v8 = vadd.f32 %v3126_v4, %v628_v47  ;;  %v3127_v45 = vld [vmem:[#allocation43_spill] sm:$0xff] }
 0x1e1   :  { %821 = vperm.xlu0 %1617, %v1775_v19  }
 0x1e2   :  { %v2441_v27 = vpop.permute.xlu0 %459  ;;  %v804_v26 = vadd.f32 %v788_v16, %v708_v8 }
 0x1e3   :  { %v782_v2 = vpop.permute.xlu1 %781 }
 0x1e4   :  { %v799_v9 = vmul.f32 %v782_v2, %v2334_v1  ;;  %1078 = vperm.xlu1 %1601, %v1991_v50   ;;  %v3128_v2 = vld [vmem:[#allocation83_spill] sm:$0xff] }
 0x1e5   :  { %1083 = vperm.xlu2 %1602, %v2191_v14   ;;  %v850_v19 = vpop.permute.xlu2 %849 }
 0x1e6   :  { %v2449_v39 = vadd.f32 %v799_v9, %v719_v35  ;;  %v888_v42 = vmul.f32 %v850_v19, %v2370_v11  ;;  %v3129_v9 = vld [vmem:[#allocation89_spill] sm:$0xff] }
 0x1e7   :  { %v631_v19 = vmul.f32 %v3129_v9, %v2331_v25 }
 0x1e8   :  { %3122 = vst [vmem:[#allocation103_spill] sm:$0xff] %v2449_v39  ;;  %v2456_v33 = vadd.f32 %v888_v42, %v808_v59  ;;  %v791_v42 = vmul.f32 %v2342_v32, %v2334_v1 }
 0x1e9   :  { %841 = vperm.xlu0 %1617, %v1783_v20   ;;  %v711_v34 = vadd.f32 %v3130_v57, %v631_v19  ;;  %v797_v19 = vmul.f32 %v2367_v48, %v2334_v1  ;;  %v3139_v48 = vld [vmem:[#allocation6_spill] sm:$0xff] }
 0x1ea   :  { %v2462_v36 = vpop.permute.xlu0 %471 }
 0x1ec   :  { %1093 = vperm.xlu1 %1601, %v2005_v5   ;;  %v826_v31 = vpop.permute.xlu1 %825 }
 0x1ed   :  { %v882_v40 = vmul.f32 %v826_v31, %v2370_v11  ;;  %1098 = vperm.xlu2 %1602, %v3123_v54   ;;  %v862_v61 = vpop.permute.xlu2 %861 }
 0x1ee   :  { %v891_v20 = vmul.f32 %v862_v61, %v2370_v11  ;;  %v3132_v61 = vmov 3  }
 0x1ef   :  { %v898_v30 = vadd.f32 %v882_v40, %v802_v28  ;;  %v807_v28 = vadd.f32 %v791_v42, %v711_v34 }
 0x1f0   :  { %v2471_v0 = vadd.f32 %v891_v20, %v811_v63 }
 0x1f1   :  { %853 = vperm.xlu0 %1617, %v1793_v22   ;;  %v914_v60 = vmax.f32 %v898_v30, 0.0  ;;  %v794_v30 = vmul.f32 %v2353_v58, %v2334_v1 }
 0x1f2   :  { %v2478_v5 = vpop.permute.xlu0 %483 }
 0x1f4   :  { %1108 = vperm.xlu1 %1601, %v3127_v45   ;;  %v834_v10 = vpop.permute.xlu1 %833 }
 0x1f5   :  { %v884_v53 = vmul.f32 %v834_v10, %v2370_v11  ;;  %1113 = vperm.xlu2 %1602, %v3128_v2   ;;  %v874_v62 = vpop.permute.xlu2 %873 }
 0x1f6   :  { %v894_v35 = vmul.f32 %v874_v62, %v2370_v11 }
 0x1f7   :  { %v900_v59 = vadd.f32 %v884_v53, %v804_v26 }
 0x1f8   :  { %v2488_v22 = vadd.f32 %v894_v35, %v2344_v29  ;;  %v3133_v29 = vld [vmem:[#allocation3_spill] sm:$0xff] }
 0x1f9   :  { %865 = vperm.xlu0 %1617, %v1801_v23   ;;  %v3134_v23 = vld [vmem:[#allocation92_spill] sm:$0xff]  ;;  %v916_v53 = vmax.f32 %v900_v59, 0.0 }
 0x1fa   :  { %v938_v15 = vpop.permute.xlu0 %937  ;;  %v634_v32 = vmul.f32 %v3134_v23, %v2331_v25 }
 0x1fb   :  { %v2494_v51 = vmul.f32 %v938_v15, %v914_v60  ;;  %v3137_v15 = vld [vmem:[#allocation71_spill] sm:$0xff] }
 0x1fc   :  { %1123 = vperm.xlu1 %1601, %v3131_v52   ;;  %v846_v31 = vpop.permute.xlu1 %845  ;;  %v714_v16 = vadd.f32 %v3135_v18, %v634_v32 }
 0x1fd   :  { %v887_v40 = vmul.f32 %v846_v31, %v2370_v11  ;;  %1604 = vset.pattern.permute.xlu2 %v3132_v61 }
 0x1fe   :  { %1143 = vperm.xlu2 %1604, %v3133_v29   ;;  %v2500_v63 = vpop.permute.xlu2 %933  ;;  %v810_v10 = vadd.f32 %v794_v30, %v714_v16  ;;  %v915_v16 = vmax.f32 %v2411_v43, 0.0 }
 0x1ff   :  { %v903_v20 = vadd.f32 %v887_v40, %v807_v28  ;;  %v3138_v28 = vld [vmem:[#allocation4_spill] sm:$0xff] }
 0x201   :  { %877 = vperm.xlu0 %1617, %v1809_v24   ;;  %v919_v17 = vmax.f32 %v903_v20, 0.0  ;;  %v3136_v24 = vld [vmem:[#allocation95_spill] sm:$0xff]  ;;  %v912_v20 = vmax.f32 %v2392_v6, 0.0  ;;  %v3142_v6 = vld [vmem:[#allocation8_spill] sm:$0xff] }
 0x202   :  { %v958_v47 = vpop.permute.xlu0 %957  ;;  %v637_v62 = vmul.f32 %v3136_v24, %v2331_v25 }
 0x203   :  { %v2508_v4 = vmul.f32 %v958_v47, %v919_v17 }
 0x204   :  { %1605 = vset.pattern.permute.xlu1 %v3132_v61  ;;  %v858_v8 = vpop.permute.xlu1 %857  ;;  %v717_v57 = vadd.f32 %v3137_v15, %v637_v62 }
 0x205   :  { %v890_v26 = vmul.f32 %v858_v8, %v2370_v11  ;;  %1151 = vperm.xlu1 %1605, %v2177_v37  }
 0x206   :  { %1155 = vperm.xlu2 %1604, %v2329_v21   ;;  %v946_v58 = vpop.permute.xlu2 %945  ;;  %v813_v52 = vadd.f32 %v797_v19, %v717_v57  ;;  %v920_v19 = vmax.f32 %v2456_v33, 0.0  ;;  %v3151_v57 = vld [vmem:[#allocation7_spill] sm:$0xff]  ;;  %v3152_v33 = vld [vmem:[#allocation9_spill] sm:$0xff] }
 0x207   :  { %v906_v35 = vadd.f32 %v890_v26, %v810_v10  ;;  %v2516_v9 = vmul.f32 %v946_v58, %v916_v53  ;;  %v3144_v26 = vmov 4   ;;  %v917_v58 = vmax.f32 %v2435_v44, 0.0  ;;  %v1628_v44 = vld [vmem:[%s2986_s1 + $0x100] sm:$0xff] }
 0x209   :  { %1319 = vperm.xlu0 %1617, %v3133_v29   ;;  %v922_v42 = vmax.f32 %v906_v35, 0.0 }
 0x20a   :  { %v970_v60 = vpop.permute.xlu0 %969 }
 0x20b   :  { %v2522_v34 = vmul.f32 %v970_v60, %v922_v42  ;;  %v3149_v42 = vmov 1  }
 0x20c   :  { %v870_v59 = vpop.permute.xlu1 %869 }
 0x20d   :  { %v893_v31 = vmul.f32 %v870_v59, %v2370_v11  ;;  %1159 = vperm.xlu1 %1605, %v2422_v46   ;;  %v124_v59 = vmul.f32 %v3151_v57, %v2331_v25 }
 0x20e   :  { %1163 = vperm.xlu2 %1604, %v3138_v28   ;;  %v2527_v40 = vpop.permute.xlu2 %953 }
 0x20f   :  { %v909_v61 = vadd.f32 %v893_v31, %v813_v52  ;;  %v126_v52 = vmul.f32 %v3152_v33, %v2331_v25  ;;  %v3153_v31 = vld [vmem:[#allocation33_spill] sm:$0xff] }
 0x210   :  { %v284_v28 = vmul.f32 %v3153_v31, %v2334_v1  ;;  %v3164_v33 = vld [vmem:[#allocation17_spill] sm:$0xff] }
 0x211   :  { %1351 = vperm.xlu0 %1617, %v3139_v48   ;;  %v925_v29 = vmax.f32 %v909_v61, 0.0  ;;  %v128_v31 = vmul.f32 %v3164_v33, %v2331_v25  ;;  %v923_v33 = vmax.f32 %v2471_v0, 0.0  ;;  %v3174_v0 = vld [vmem:[#allocation19_spill] sm:$0xff] }
 0x212   :  { %v982_v23 = vpop.permute.xlu0 %981 }
 0x213   :  { %v2530_v32 = vmul.f32 %v982_v23, %v925_v29  ;;  %v3156_v23 = vld [vmem:[#allocation12_spill] sm:$0xff] }
 0x215   :  { %3140 = vst [vmem:[#allocation80_spill] sm:$0xff] %v2530_v32  ;;  %1171 = vperm.xlu1 %1605, %v2191_v14   ;;  %v930_v30 = vpop.permute.xlu1 %929 }
 0x216   :  { %v2534_v17 = vmul.f32 %v930_v30, %v912_v20  ;;  %1175 = vperm.xlu2 %1604, %v3139_v48   ;;  %v2537_v47 = vpop.permute.xlu2 %965  ;;  %v3155_v48 = vld [vmem:[#allocation11_spill] sm:$0xff]  ;;  %v2585_v20 = vmul.f32 %v3156_v23, %v2331_v25  ;;  %v3157_v30 = vld [vmem:[#allocation13_spill] sm:$0xff] }
 0x217   :  { %v129_v29 = vmul.f32 %v3155_v48, %v2331_v25  ;;  %v3165_v48 = vld [vmem:[#allocation18_spill] sm:$0xff] }
 0x219   :  { %1371 = vperm.xlu0 %1617, %v3128_v2  }
 0x21a   :  { %v2540_v18 = vpop.permute.xlu0 %1431 }
 0x21b   :  { %3141 = vst [vmem:[#allocation87_spill] sm:$0xff] %v2540_v18 }
 0x21d   :  { %1183 = vperm.xlu1 %1605, %v3123_v54   ;;  %v942_v8 = vpop.permute.xlu1 %941  ;;  %v3146_v54 = vld [vmem:[#allocation10_spill] sm:$0xff] }
 0x21e   :  { %v2544_v10 = vmul.f32 %v942_v8, %v915_v16  ;;  %1187 = vperm.xlu2 %1604, %v3142_v6   ;;  %v2547_v14 = vpop.permute.xlu2 %977  ;;  %v122_v16 = vmul.f32 %v3157_v30, %v2331_v25  ;;  %v3158_v8 = vld [vmem:[#allocation40_spill] sm:$0xff]  ;;  %v3166_v30 = vld [vmem:[#allocation86_spill] sm:$0xff] }
 0x21f   :  { %3143 = vst [vmem:[#allocation98_spill] sm:$0xff] %v2547_v14  ;;  %v283_v6 = vmul.f32 %v3158_v8, %v2334_v1  ;;  %v287_v8 = vmul.f32 %v3166_v30, %v2334_v1  ;;  %v3186_v14 = vld [vmem:[#allocation73_spill] sm:$0xff] }
 0x220   :  { %v202_v23 = vadd.f32 %v3165_v48, %v122_v16  ;;  %v3171_v16 = vld [vmem:[#allocation35_spill] sm:$0xff] }
 0x221   :  { %1622 = vset.pattern.permute.xlu0 %v3144_v26  ;;  %v286_v48 = vmul.f32 %v3171_v16, %v2334_v1  ;;  %v3180_v16 = vld [vmem:[#allocation32_spill] sm:$0xff] }
 0x222   :  { %v2550_v53 = vpop.permute.xlu0 %1443  ;;  %1479 = vperm.xlu0 %1622, %v3127_v45   ;;  %v3150_v45 = vld [vmem:[#allocation5_spill] sm:$0xff] }
 0x223   :  { %3145 = vst [vmem:[#allocation93_spill] sm:$0xff] %v2550_v53  ;;  %v3169_v53 = vld [vmem:[#allocation54_spill] sm:$0xff] }
 0x225   :  { %1195 = vperm.xlu1 %1605, %v3128_v2   ;;  %v950_v43 = vpop.permute.xlu1 %949  ;;  %v123_v2 = vmul.f32 %v3150_v45, %v2331_v25  ;;  %v3163_v45 = vld [vmem:[#allocation16_spill] sm:$0xff] }
 0x226   :  { %v2555_v24 = vmul.f32 %v950_v43, %v917_v58  ;;  %1199 = vperm.xlu2 %1604, %v3146_v54   ;;  %v2558_v62 = vpop.permute.xlu2 %989  ;;  %v3159_v58 = vld [vmem:[#allocation15_spill] sm:$0xff]  ;;  %v3160_v54 = vld [vmem:[#allocation29_spill] sm:$0xff]  ;;  %v127_v57 = vmul.f32 %v3163_v45, %v2331_v25  ;;  %v299_v45 = vadd.f32 %v283_v6, %v202_v23  ;;  %v3175_v6 = vld [vmem:[#allocation20_spill] sm:$0xff] }
 0x227   :  { %3147 = vst [vmem:[#allocation43_spill] sm:$0xff] %v2558_v62  ;;  %v125_v43 = vmul.f32 %v3159_v58, %v2331_v25  ;;  %v3167_v58 = vld [vmem:[#allocation21_spill] sm:$0xff]  ;;  %v206_v62 = vadd.f32 %v3170_v55, %v126_v52  ;;  %v130_v52 = vmul.f32 %v3174_v0, %v2331_v25 }
 0x229   :  { %v205_v18 = vadd.f32 %v3169_v53, %v125_v43  ;;  %v303_v43 = vadd.f32 %v287_v8, %v206_v62  ;;  %v3179_v8 = vld [vmem:[#allocation88_spill] sm:$0xff] }
 0x22a   :  { %v2560_v35 = vpop.permute.xlu0 %1459 }
 0x22b   :  { %3148 = vst [vmem:[#allocation83_spill] sm:$0xff] %v2560_v35  ;;  %v204_v35 = vadd.f32 %v3167_v58, %v124_v59  ;;  %v3172_v59 = vld [vmem:[#allocation60_spill] sm:$0xff] }
 0x22c   :  { %v3173_v58 = vld [vmem:[#allocation48_spill] sm:$0xff] }
 0x22d   :  { %1607 = vset.pattern.permute.xlu1 %v3149_v42  ;;  %v962_v60 = vpop.permute.xlu1 %961  ;;  %v288_v53 = vmul.f32 %v3173_v58, %v2334_v1 }
 0x22e   :  { %v2564_v15 = vmul.f32 %v962_v60, %v920_v19  ;;  %1608 = vset.pattern.permute.xlu2 %v3149_v42  ;;  %1223 = vperm.xlu1 %1607, %v1628_v44   ;;  %v3161_v19 = vld [vmem:[#allocation44_spill] sm:$0xff]  ;;  %v3162_v60 = vld [vmem:[#allocation57_spill] sm:$0xff] }
 0x22f   :  { %1227 = vperm.xlu2 %1608, %v1977_v56   ;;  %v2579_v61 = vpop.permute.xlu2 %1058  ;;  %v203_v56 = vadd.f32 %v3160_v54, %v123_v2  ;;  %v285_v42 = vmul.f32 %v3161_v19, %v2334_v1  ;;  %v381_v44 = vmul.f32 %v3162_v60, %v2370_v11  ;;  %v3168_v54 = vld [vmem:[#allocation51_spill] sm:$0xff] }
 0x230   :  { %3154 = vst [vmem:[#allocation89_spill] sm:$0xff] %v2579_v61  ;;  %v382_v19 = vmul.f32 %v3168_v54, %v2370_v11  ;;  %v3185_v61 = vld [vmem:[#allocation63_spill] sm:$0xff] }
 0x231   :  { %v300_v2 = vadd.f32 %v284_v28, %v203_v56  ;;  %v301_v30 = vadd.f32 %v285_v42, %v204_v35  ;;  %v383_v28 = vmul.f32 %v3172_v59, %v2370_v11  ;;  %v131_v35 = vmul.f32 %v3175_v6, %v2331_v25 }
 0x232   :  { %v209_v59 = vadd.f32 %v3180_v16, %v129_v29 }
 0x233   :  { %v324_v60 = vpop.permute.xlu0 %323  ;;  %v397_v32 = vadd.f32 %v381_v44, %v300_v2  ;;  %v398_v42 = vadd.f32 %v382_v19, %v301_v30  ;;  %v302_v44 = vadd.f32 %v286_v48, %v205_v18  ;;  %v3177_v2 = vld [vmem:[#allocation24_spill] sm:$0xff]  ;;  %v3182_v18 = vld [vmem:[#allocation38_spill] sm:$0xff] }
 0x234   :  { %v380_v39 = vmul.f32 %v324_v60, %v2370_v11  ;;  %v207_v60 = vadd.f32 %v3177_v2, %v127_v57  ;;  %v289_v48 = vmul.f32 %v3182_v18, %v2334_v1  ;;  %v3184_v2 = vld [vmem:[#allocation55_spill] sm:$0xff] }
 0x235   :  { %v974_v56 = vpop.permute.xlu1 %973  ;;  %v413_v0 = vmax.f32 %v397_v32, 0.0  ;;  %v399_v19 = vadd.f32 %v383_v28, %v302_v44  ;;  %v3187_v44 = vld [vmem:[#allocation67_spill] sm:$0xff] }
 0x236   :  { %v396_v54 = vadd.f32 %v380_v39, %v299_v45  ;;  %v2618_v55 = vmul.f32 %v974_v56, %v923_v33  ;;  %1235 = vperm.xlu1 %1607, %v2329_v21   ;;  %v3178_v39 = vld [vmem:[#allocation53_spill] sm:$0xff]  ;;  %v290_v45 = vmul.f32 %v3179_v8, %v2334_v1  ;;  %v3181_v56 = vld [vmem:[#allocation56_spill] sm:$0xff]  ;;  %v304_v30 = vadd.f32 %v288_v53, %v207_v60  ;;  %v3188_v60 = vld [vmem:[#allocation91_spill] sm:$0xff] }
 0x237   :  { %1239 = vperm.xlu2 %1608, %v2422_v46   ;;  %v2626_v23 = vpop.permute.xlu2 %1068  ;;  %v384_v62 = vmul.f32 %v3178_v39, %v2370_v11  ;;  %v208_v58 = vadd.f32 %v3181_v56, %v128_v31  ;;  %v387_v39 = vmul.f32 %v3184_v2, %v2370_v11  ;;  %v386_v8 = vmul.f32 %v3185_v61, %v2370_v11 }
 0x238   :  { %3176 = vst [vmem:[#allocation66_spill] sm:$0xff] %v2626_v23  ;;  %v412_v33 = vmax.f32 %v396_v54, 0.0  ;;  %v3183_v23 = vld [vmem:[#allocation64_spill] sm:$0xff]  ;;  %v414_v54 = vmax.f32 %v398_v42, 0.0  ;;  %v493_v29 = vmul.f32 %v3186_v14, %v413_v0  ;;  %v306_v31 = vadd.f32 %v290_v45, %v209_v59  ;;  %v3190_v59 = vld [vmem:[#allocation50_spill] sm:$0xff]  ;;  %v3191_v0 = vld [vmem:[#allocation59_spill] sm:$0xff] }
 0x239   :  { %v400_v6 = vadd.f32 %v384_v62, %v303_v43  ;;  %v926_v53 = vmax.f32 %v2488_v22, 0.0  ;;  %v305_v43 = vadd.f32 %v289_v48, %v208_v58  ;;  %v293_v62 = vmul.f32 %v3188_v60, %v2334_v1  ;;  %v3189_v22 = vld [vmem:[#allocation34_spill] sm:$0xff] }
 0x23a   :  { %v492_v57 = vmul.f32 %v3183_v23, %v412_v33  ;;  %v494_v23 = vmul.f32 %v3187_v44, %v414_v54  ;;  %v415_v33 = vmax.f32 %v399_v19, 0.0  ;;  %v212_v45 = vadd.f32 %v3189_v22, %v2585_v20 }
 0x23b   :  { %v344_v16 = vpop.permute.xlu0 %343  ;;  %v416_v61 = vmax.f32 %v400_v6, 0.0  ;;  %v291_v58 = vmul.f32 %v3190_v59, %v2334_v1  ;;  %v211_v19 = vadd.f32 %v3191_v0, %v131_v35  ;;  %v402_v48 = vadd.f32 %v386_v8, %v305_v43  ;;  %v3195_v35 = vld [vmem:[#allocation14_spill] sm:$0xff]  ;;  %v3200_v0 = vld [vmem:[#allocation23_spill] sm:$0xff] }
 0x23c   :  { %v507_v32 = vadd.f32 %v2405_v13, %v492_v57  ;;  %v385_v28 = vmul.f32 %v344_v16, %v2370_v11  ;;  %v2654_v13 = vld [vmem:[%s2986_s1 + $0x128] sm:$0xff]  ;;  %v403_v6 = vadd.f32 %v387_v39, %v306_v31  ;;  %v495_v57 = vmul.f32 %v2417_v49, %v415_v33  ;;  %v3197_v49 = vld [vmem:[#allocation58_spill] sm:$0xff] }
 0x23d   :  { %v986_v56 = vpop.permute.xlu1 %985  ;;  %v309_v44 = vadd.f32 %v293_v62, %v212_v45  ;;  %v135_v8 = vmul.f32 %v3195_v35, %v2331_v25  ;;  %v390_v31 = vmul.f32 %v3197_v49, %v2370_v11  ;;  %v418_v33 = vmax.f32 %v402_v48, 0.0  ;;  %v3199_v62 = vld [vmem:[#allocation22_spill] sm:$0xff]  ;;  %v3204_v35 = vld [vmem:[#allocation37_spill] sm:$0xff] }
 0x23e   :  { %v508_v42 = vadd.f32 %v507_v32, %v493_v29  ;;  %v401_v18 = vadd.f32 %v385_v28, %v304_v30  ;;  %v2649_v14 = vmul.f32 %v986_v56, %v926_v53  ;;  %1243 = vperm.xlu1 %1607, %v2654_v13   ;;  %v3192_v29 = vld [vmem:[#allocation26_spill] sm:$0xff]  ;;  %v3193_v32 = vld [vmem:[#allocation41_spill] sm:$0xff]  ;;  %v419_v56 = vmax.f32 %v403_v6, 0.0 }
 0x23f   :  { %1247 = vperm.xlu2 %1608, %v1991_v50   ;;  %v2663_v30 = vpop.permute.xlu2 %1083  ;;  %v210_v16 = vadd.f32 %v3192_v29, %v130_v52  ;;  %v292_v20 = vmul.f32 %v3193_v32, %v2334_v1  ;;  %v3194_v28 = vld [vmem:[#allocation65_spill] sm:$0xff]  ;;  %v3196_v50 = vld [vmem:[#allocation76_spill] sm:$0xff]  ;;  %v133_v45 = vmul.f32 %v3199_v62, %v2331_v25 }
 0x240   :  { %v509_v2 = vadd.f32 %v508_v42, %v494_v23  ;;  %v417_v54 = vmax.f32 %v401_v18, 0.0  ;;  %v389_v53 = vmul.f32 %v3194_v28, %v2370_v11  ;;  %v496_v43 = vmul.f32 %v3196_v50, %v416_v61  ;;  %v3198_v18 = vld [vmem:[#allocation70_spill] sm:$0xff]  ;;  %v3202_v32 = vld [vmem:[#allocation52_spill] sm:$0xff] }
 0x241   :  { %v307_v39 = vadd.f32 %v291_v58, %v210_v16  ;;  %v308_v23 = vadd.f32 %v292_v20, %v211_v19  ;;  %v134_v61 = vmul.f32 %v3200_v0, %v2331_v25  ;;  %v498_v19 = vmul.f32 %v2441_v27, %v418_v33  ;;  %v3203_v28 = vld [vmem:[#allocation62_spill] sm:$0xff]  ;;  %v2699_v27 = vld [vmem:[%s2986_s1 + $0x148] sm:$0xff]  ;;  %v3207_v33 = vld [vmem:[#allocation45_spill] sm:$0xff] }
 0x242   :  { %v510_v60 = vadd.f32 %v509_v2, %v495_v57  ;;  %v497_v22 = vmul.f32 %v3198_v18, %v417_v54  ;;  %v406_v57 = vadd.f32 %v390_v31, %v309_v44  ;;  %v3201_v2 = vld [vmem:[#allocation94_spill] sm:$0xff]  ;;  %v2688_v54 = vld [vmem:[%s2986_s1 + $0x140] sm:$0xff]  ;;  %v294_v20 = vmul.f32 %v3202_v32, %v2334_v1  ;;  %v3206_v31 = vld [vmem:[#allocation28_spill] sm:$0xff] }
 0x243   :  { %v356_v52 = vpop.permute.xlu0 %355  ;;  %v405_v58 = vadd.f32 %v389_v53, %v308_v23  ;;  %v296_v29 = vmul.f32 %v3201_v2, %v2334_v1  ;;  %v214_v53 = vadd.f32 %v3203_v28, %v134_v61  ;;  %v215_v50 = vadd.f32 %v3204_v35, %v135_v8  ;;  %v3209_v61 = vld [vmem:[#allocation72_spill] sm:$0xff] }
 0x244   :  { %v511_v42 = vadd.f32 %v510_v60, %v496_v43  ;;  %v388_v59 = vmul.f32 %v356_v52, %v2370_v11  ;;  %v3205_v43 = vld [vmem:[#allocation78_spill] sm:$0xff]  ;;  %v213_v23 = vadd.f32 %v3206_v31, %v133_v45  ;;  %v295_v52 = vmul.f32 %v3207_v33, %v2334_v1 }
 0x245   :  { %v499_v60 = vmul.f32 %v3205_v43, %v419_v56  ;;  %v312_v62 = vadd.f32 %v296_v29, %v215_v50  ;;  %v3210_v56 = vld [vmem:[#allocation61_spill] sm:$0xff] }
 0x246   :  { %v512_v48 = vadd.f32 %v511_v42, %v497_v22  ;;  %v404_v6 = vadd.f32 %v388_v59, %v307_v39  ;;  %1255 = vperm.xlu1 %1607, %v2688_v54   ;;  %v2691_v16 = vpop.permute.xlu1 %1053  ;;  %v3208_v42 = vld [vmem:[#allocation68_spill] sm:$0xff]  ;;  %v421_v22 = vmax.f32 %v405_v58, 0.0  ;;  %v422_v59 = vmax.f32 %v406_v57, 0.0  ;;  %v3211_v43 = vld [vmem:[#allocation81_spill] sm:$0xff] }
 0x247   :  { %1259 = vperm.xlu2 %1608, %v2699_v27   ;;  %v2702_v44 = vpop.permute.xlu2 %1098  ;;  %v392_v18 = vmul.f32 %v3208_v42, %v2370_v11  ;;  %v310_v32 = vadd.f32 %v294_v20, %v213_v23  ;;  %v311_v8 = vadd.f32 %v295_v52, %v214_v53  ;;  %v2720_v20 = vld [vmem:[%s2986_s1 + $0x158] sm:$0xff] }
 0x248   :  { %v513_v39 = vadd.f32 %v512_v48, %v498_v19  ;;  %v420_v49 = vmax.f32 %v404_v6, 0.0  ;;  %v393_v19 = vmul.f32 %v3210_v56, %v2370_v11  ;;  %v501_v45 = vmul.f32 %v2462_v36, %v421_v22  ;;  %v2726_v36 = vld [vmem:[%s2986_s1 + $0x160] sm:$0xff]  ;;  %v3213_v52 = vld [vmem:[#allocation90_spill] sm:$0xff] }
 0x249   :  { %v408_v35 = vadd.f32 %v392_v18, %v311_v8  ;;  %v502_v31 = vmul.f32 %v3211_v43, %v422_v59  ;;  %v3214_v59 = vld [vmem:[#allocation75_spill] sm:$0xff]  ;;  %v790_v43 = vmul.f32 %v2386_v38, %v2334_v1 }
 0x24a   :  { %v514_v0 = vadd.f32 %v513_v39, %v499_v60  ;;  %v500_v2 = vmul.f32 %v3209_v61, %v420_v49  ;;  %v409_v58 = vadd.f32 %v393_v19, %v312_v62  ;;  %v3212_v60 = vld [vmem:[#allocation25_spill] sm:$0xff]  ;;  %v785_v49 = vmul.f32 %v2350_v7, %v2334_v1 }
 0x24b   :  { %v368_v28 = vpop.permute.xlu0 %367  ;;  %v625_v39 = vmul.f32 %v3212_v60, %v2331_v25  ;;  %v424_v22 = vmax.f32 %v408_v35, 0.0  ;;  %v2743_v7 = vld [vmem:[%s2986_s1 + $0x170] sm:$0xff] }
 0x24c   :  { %v515_v48 = vadd.f32 %v514_v0, %v500_v2  ;;  %v391_v6 = vmul.f32 %v368_v28, %v2370_v11  ;;  %v425_v18 = vmax.f32 %v409_v58, 0.0  ;;  %v3215_v28 = vld [vmem:[#allocation84_spill] sm:$0xff] }
 0x24d   :  { %v705_v42 = vadd.f32 %v3213_v52, %v625_v39  ;;  %v504_v2 = vmul.f32 %v2478_v5, %v424_v22  ;;  %v2751_v5 = vld [vmem:[%s2986_s1 + $0x178] sm:$0xff] }
 0x24e   :  { %v516_v57 = vadd.f32 %v515_v48, %v501_v45  ;;  %v407_v29 = vadd.f32 %v391_v6, %v310_v32  ;;  %1267 = vperm.xlu1 %1607, %v2720_v20   ;;  %v1064_v53 = vpop.permute.xlu1 %1063  ;;  %v505_v56 = vmul.f32 %v3215_v28, %v425_v18  ;;  %v3216_v6 = vld [vmem:[#allocation27_spill] sm:$0xff] }
 0x24f   :  { %1271 = vperm.xlu2 %1608, %v2726_v36   ;;  %v2729_v50 = vpop.permute.xlu2 %1113  ;;  %v801_v61 = vadd.f32 %v785_v49, %v705_v42  ;;  %v630_v35 = vmul.f32 %v3216_v6, %v2331_v25  ;;  %v1129_v22 = vmul.f32 %v1064_v53, %v2331_v25 }
 0x250   :  { %v517_v23 = vadd.f32 %v516_v57, %v502_v31  ;;  %v423_v33 = vmax.f32 %v407_v29, 0.0  ;;  %v3217_v29 = vld [vmem:[#allocation96_spill] sm:$0xff] }
 0x251   :  { %v710_v60 = vadd.f32 %v3217_v29, %v630_v35 }
 0x252   :  { %v503_v62 = vmul.f32 %v3214_v59, %v423_v33 }
 0x253   :  { %v822_v0 = vpop.permute.xlu0 %821 }
 0x254   :  { %v518_v32 = vadd.f32 %v517_v23, %v503_v62  ;;  %v881_v8 = vmul.f32 %v822_v0, %v2370_v11  ;;  %v806_v23 = vadd.f32 %v790_v43, %v710_v60 }
 0x256   :  { %v519_v19 = vadd.f32 %v518_v32, %v504_v2  ;;  %v897_v45 = vadd.f32 %v881_v8, %v801_v61  ;;  %1279 = vperm.xlu1 %1607, %v2743_v7   ;;  %v2746_v48 = vpop.permute.xlu1 %1078  ;;  %v3219_v2 = vld [vmem:[#allocation97_spill] sm:$0xff] }
 0x257   :  { %1283 = vperm.xlu2 %1608, %v2751_v5  }
 0x258   :  { %v2758_v31 = vadd.f32 %v519_v19, %v505_v56  ;;  %v913_v58 = vmax.f32 %v897_v45, 0.0  ;;  %v2760_v57 = vpop.permute.xlu2 %1143 }
 0x25a   :  { %v993_v39 = vmul.f32 %v2500_v63, %v913_v58  ;;  %v1636_v63 = vld [vmem:[%s2986_s1 + $0x108] sm:$0xff] }
 0x25b   :  { %v842_v49 = vpop.permute.xlu0 %841 }
 0x25c   :  { %v1008_v33 = vadd.f32 %v993_v39, %v2534_v17  ;;  %v886_v52 = vmul.f32 %v842_v49, %v2370_v11  ;;  %v3218_v17 = vld [vmem:[#allocation30_spill] sm:$0xff] }
 0x25d   :  { %v633_v59 = vmul.f32 %v3218_v17, %v2331_v25  ;;  %v3222_v17 = vld [vmem:[#allocation80_spill] sm:$0xff] }
 0x25e   :  { %v1009_v42 = vadd.f32 %v1008_v33, %v2494_v51  ;;  %v902_v18 = vadd.f32 %v886_v52, %v806_v23  ;;  %1610 = vset.pattern.permute.xlu1 %v3108_v41  ;;  %v2768_v38 = vpop.permute.xlu1 %1093  ;;  %v793_v51 = vmul.f32 %v2400_v12, %v2334_v1 }
 0x25f   :  { %1611 = vset.pattern.permute.xlu2 %v3108_v41  ;;  %1323 = vperm.xlu1 %1610, %v1636_v63   ;;  %v713_v32 = vadd.f32 %v3219_v2, %v633_v59 }
 0x260   :  { %v1010_v62 = vadd.f32 %v1009_v42, %v2544_v10  ;;  %v918_v0 = vmax.f32 %v902_v18, 0.0  ;;  %1327 = vperm.xlu2 %1611, %v2177_v37   ;;  %v1156_v61 = vpop.permute.xlu2 %1155  ;;  %v521_v42 = vrot.slane %v2758_v31, 4  ;;  %v3221_v18 = vld [vmem:[#allocation89_spill] sm:$0xff] }
 0x261   :  { %v2781_v53 = vadd.f32 %v1156_v61, %v1129_v22  ;;  %v809_v56 = vadd.f32 %v793_v51, %v713_v32  ;;  %v1128_v22 = vmul.f32 %v3221_v18, %v2331_v25 }
 0x262   :  { %v1011_v8 = vadd.f32 %v1010_v62, %v2516_v9  ;;  %v998_v45 = vmul.f32 %v2527_v40, %v918_v0  ;;  %v3224_v62 = vld [vmem:[#allocation99_spill] sm:$0xff] }
 0x263   :  { %v854_v28 = vpop.permute.xlu0 %853  ;;  %v1288_v0 = vmul.f32 %v3224_v62, %v2334_v1 }
 0x264   :  { %v1012_v19 = vadd.f32 %v1011_v8, %v2555_v24  ;;  %v889_v12 = vmul.f32 %v854_v28, %v2370_v11  ;;  %v1637_v28 = vld [vmem:[%s2986_s1 + $0x130] sm:$0xff] }
 0x266   :  { %v1013_v6 = vadd.f32 %v1012_v19, %v998_v45  ;;  %v905_v10 = vadd.f32 %v889_v12, %v809_v56  ;;  %v2788_v35 = vpop.permute.xlu1 %1108  ;;  %v1638_v19 = vld [vmem:[%s2986_s1 + $0x110] sm:$0xff]  ;;  %v3225_v45 = vld [vmem:[#allocation43_spill] sm:$0xff] }
 0x267   :  { %1331 = vperm.xlu1 %1610, %v2329_v21  }
 0x268   :  { %v1014_v37 = vadd.f32 %v1013_v6, %v2508_v4  ;;  %v921_v43 = vmax.f32 %v905_v10, 0.0  ;;  %1335 = vperm.xlu2 %1611, %v2422_v46   ;;  %v2793_v9 = vpop.permute.xlu2 %1163  ;;  %v3226_v10 = vld [vmem:[#allocation66_spill] sm:$0xff] }
 0x26a   :  { %v1015_v58 = vadd.f32 %v1014_v37, %v2564_v15  ;;  %v1001_v24 = vmul.f32 %v2537_v47, %v921_v43  ;;  %v3220_v47 = vld [vmem:[#allocation98_spill] sm:$0xff]  ;;  %v1130_v37 = vmul.f32 %v3226_v10, %v2331_v25 }
 0x26b   :  { %v866_v40 = vpop.permute.xlu0 %865  ;;  %v3230_v10 = vld [vmem:[#allocation102_spill] sm:$0xff] }
 0x26c   :  { %v1016_v29 = vadd.f32 %v1015_v58, %v1001_v24  ;;  %v892_v60 = vmul.f32 %v866_v40, %v2370_v11 }
 0x26e   :  { %v1017_v39 = vadd.f32 %v1016_v29, %v2522_v34  ;;  %v908_v49 = vadd.f32 %v892_v60, %v2430_v3  ;;  %v2800_v21 = vpop.permute.xlu1 %1123 }
 0x26f   :  { %1612 = vset.pattern.permute.xlu1 %v3144_v26 }
 0x270   :  { %v1018_v4 = vadd.f32 %v1017_v39, %v2618_v55  ;;  %v924_v23 = vmax.f32 %v908_v49, 0.0  ;;  %1339 = vperm.xlu2 %1611, %v2654_v13   ;;  %v2805_v15 = vpop.permute.xlu2 %1175  ;;  %1435 = vperm.xlu1 %1612, %v1636_v63   ;;  %v3223_v55 = vld [vmem:[#allocation103_spill] sm:$0xff]  ;;  %v522_v63 = vadd.f32 %v521_v42, %v2758_v31  ;;  %v1639_v39 = vld [vmem:[%s2986_s1 + $0x138] sm:$0xff] }
 0x272   :  { %v1004_v33 = vmul.f32 %v3220_v47, %v924_v23  ;;  %v523_v31 = vrot.slane %v522_v63, 2  ;;  %v1127_v47 = vmul.f32 %v2691_v16, %v2331_v25 }
 0x273   :  { %v878_v52 = vpop.permute.xlu0 %877 }
 0x274   :  { %v1019_v34 = vadd.f32 %v1018_v4, %v1004_v33  ;;  %v895_v3 = vmul.f32 %v878_v52, %v2370_v11  ;;  %v524_v60 = vadd.f32 %v523_v31, %v522_v63  ;;  %v1133_v33 = vmul.f32 %v2663_v30, %v2331_v25  ;;  %v3229_v63 = vld [vmem:[#allocation101_spill] sm:$0xff] }
 0x275   :  { %v1132_v31 = vmul.f32 %v2746_v48, %v2331_v25  ;;  %v1135_v48 = vmul.f32 %v2768_v38, %v2331_v25  ;;  %v1138_v38 = vmul.f32 %v2788_v35, %v2331_v25  ;;  %v3235_v35 = vld [vmem:[#allocation39_spill] sm:$0xff] }
 0x276   :  { %v1020_v59 = vadd.f32 %v1019_v34, %v3222_v17  ;;  %v911_v51 = vadd.f32 %v895_v3, %v3223_v55  ;;  %v525_v23 = vrot.slane %v524_v60, 1  ;;  %v3227_v34 = vld [vmem:[#allocation100_spill] sm:$0xff]  ;;  %v3228_v17 = vld [vmem:[#allocation74_spill] sm:$0xff] }
 0x277   :  { %v1152_v61 = vpop.permute.xlu1 %1151  ;;  %v1293_v3 = vmul.f32 %v3227_v34, %v2334_v1 }
 0x278   :  { %v1021_v2 = vadd.f32 %v1020_v59, %v2649_v14  ;;  %v927_v32 = vmax.f32 %v911_v51, 0.0  ;;  %v1208_v8 = vadd.f32 %v1152_v61, %v1128_v22  ;;  %1343 = vperm.xlu2 %1611, %v1637_v28   ;;  %v2821_v56 = vpop.permute.xlu2 %1187  ;;  %1439 = vperm.xlu1 %1612, %v1638_v19   ;;  %v526_v18 = vadd.f32 %v525_v23, %v524_v60 }
 0x279   :  { %v1207_v59 = vadd.f32 %v3228_v17, %v1127_v47 }
 0x27a   :  { %v1007_v12 = vmul.f32 %v3225_v45, %v927_v32  ;;  %v2827_v6 = vadd.f32 %v1288_v0, %v1208_v8  ;;  %v1136_v0 = vmul.f32 %v2702_v44, %v2331_v25  ;;  %v1139_v44 = vmul.f32 %v2729_v50, %v2331_v25 }
 0x27c   :  { %v1022_v14 = vadd.f32 %v1021_v2, %v1007_v12  ;;  %v1296_v2 = vmul.f32 %v3229_v63, %v2334_v1 }
 0x27e   :  { %v1023_v43 = vrot.slane %v1022_v14, 4 }
 0x27f   :  { %v1160_v58 = vpop.permute.xlu1 %1159 }
 0x280   :  { %v1024_v24 = vadd.f32 %v1023_v43, %v1022_v14  ;;  %v1210_v40 = vadd.f32 %v1160_v58, %v1130_v37  ;;  %1614 = vset.pattern.permute.xlu2 %v3144_v26  ;;  %v2832_v29 = vpop.permute.xlu2 %1199  ;;  %1613 = vset.pattern.permute.xlu1 %v3108_v41  ;;  %v1299_v37 = vmul.f32 %v3230_v10, %v2334_v1 }
 0x281   :  { %1447 = vperm.xlu2 %1614, %v2422_v46   ;;  %1347 = vperm.xlu1 %1613, %v1639_v39  }
 0x282   :  { %v1025_v49 = vrot.slane %v1024_v24, 2 }
 0x284   :  { %v1026_v4 = vadd.f32 %v1025_v49, %v1024_v24  ;;  %v3231_v24 = vld [vmem:[#allocation77_spill] sm:$0xff] }
 0x285   :  { %v1212_v60 = vadd.f32 %v3231_v24, %v1132_v31 }
 0x286   :  { %v1027_v52 = vrot.slane %v1026_v4, 1 }
 0x287   :  { %v1172_v42 = vpop.permute.xlu1 %1171 }
 0x288   :  { %v1213_v46 = vadd.f32 %v1172_v42, %v1133_v33  ;;  %v1028_v22 = vadd.f32 %v1027_v52, %v1026_v4  ;;  %v3233_v52 = vld [vmem:[#allocation79_spill] sm:$0xff] }
 0x289   :  { %1616 = vset.pattern.permute.xlu2 %v3108_v41  ;;  %v1228_v55 = vpop.permute.xlu2 %1227  ;;  %1615 = vset.pattern.permute.xlu1 %v3144_v26  ;;  %v1215_v42 = vadd.f32 %v3233_v52, %v1135_v48 }
 0x28a   :  { %v2848_v51 = vadd.f32 %v1293_v3, %v1213_v46  ;;  %v1287_v16 = vmul.f32 %v1228_v55, %v2334_v1  ;;  %1355 = vperm.xlu2 %1616, %v2699_v27   ;;  %1451 = vperm.xlu1 %1615, %v2654_v13   ;;  %v2853_v30 = vadd.f32 %v1028_v22, %v526_v18  ;;  %v1640_v13 = vld [vmem:[%s2986_s1 + $0x150] sm:$0xff]  ;;  %v3234_v22 = vld [vmem:[#allocation82_spill] sm:$0xff] }
 0x28b   :  { %v1218_v17 = vadd.f32 %v3234_v22, %v1138_v38  ;;  %v3240_v22 = vld [vmem:[#allocation87_spill] sm:$0xff] }
 0x28c   :  { %v2855_v62 = vadd.f32 %v1287_v16, %v1207_v59  ;;  %v1131_v16 = vmul.f32 %v3235_v35, %v2331_v25 }
 0x28f   :  { %v1184_v61 = vpop.permute.xlu1 %1183 }
 0x290   :  { %v1216_v32 = vadd.f32 %v1184_v61, %v1136_v0  ;;  %v1211_v61 = vadd.f32 %v2793_v9, %v1131_v16 }
 0x291   :  { %v1240_v8 = vpop.permute.xlu2 %1239 }
 0x292   :  { %v2861_v19 = vadd.f32 %v1296_v2, %v1216_v32  ;;  %v1290_v45 = vmul.f32 %v1240_v8, %v2334_v1  ;;  %1359 = vperm.xlu2 %1616, %v1640_v13   ;;  %1455 = vperm.xlu1 %1615, %v1637_v28  }
 0x294   :  { %v2867_v12 = vadd.f32 %v1290_v45, %v1210_v40  ;;  %v3232_v40 = vld [vmem:[#allocation36_spill] sm:$0xff] }
 0x295   :  { %v1126_v49 = vmul.f32 %v3232_v40, %v2331_v25 }
 0x297   :  { %v1196_v14 = vpop.permute.xlu1 %1195  ;;  %v1206_v23 = vadd.f32 %v2760_v57, %v1126_v49 }
 0x298   :  { %v1219_v43 = vadd.f32 %v1196_v14, %v1139_v44 }
 0x299   :  { %v1248_v58 = vpop.permute.xlu2 %1247 }
 0x29a   :  { %v2876_v39 = vadd.f32 %v1299_v37, %v1219_v43  ;;  %v1292_v28 = vmul.f32 %v1248_v58, %v2334_v1  ;;  %1619 = vset.pattern.permute.xlu2 %v3144_v26  ;;  %1618 = vset.pattern.permute.xlu1 %v3108_v41  ;;  %v1641_v37 = vld [vmem:[%s2986_s1 + $0x168] sm:$0xff] }
 0x29b   :  { %1463 = vperm.xlu2 %1619, %v2688_v54   ;;  %1363 = vperm.xlu1 %1618, %v2720_v20  }
 0x29c   :  { %v2883_v50 = vadd.f32 %v1292_v28, %v1212_v60 }
 0x2a0   :  { %v1224_v4 = vpop.permute.xlu1 %1223 }
 0x2a1   :  { %v1286_v47 = vmul.f32 %v1224_v4, %v2334_v1  ;;  %v1260_v33 = vpop.permute.xlu2 %1259 }
 0x2a2   :  { %v1295_v54 = vmul.f32 %v1260_v33, %v2334_v1 }
 0x2a3   :  { %v1302_v34 = vadd.f32 %v1286_v47, %v1206_v23  ;;  %1467 = vperm.xlu2 %1619, %v2699_v27   ;;  %1367 = vperm.xlu1 %1618, %v2726_v36   ;;  %v1141_v36 = vmul.f32 %v2800_v21, %v2331_v25  ;;  %v3237_v21 = vld [vmem:[#allocation42_spill] sm:$0xff] }
 0x2a4   :  { %v2895_v3 = vadd.f32 %v1295_v54, %v1215_v42 }
 0x2a8   :  { %v1236_v46 = vpop.permute.xlu1 %1235 }
 0x2a9   :  { %v1289_v57 = vmul.f32 %v1236_v46, %v2334_v1  ;;  %v1272_v18 = vpop.permute.xlu2 %1271 }
 0x2aa   :  { %v1298_v59 = vmul.f32 %v1272_v18, %v2334_v1 }
 0x2ab   :  { %v1305_v55 = vadd.f32 %v1289_v57, %v2781_v53  ;;  %1621 = vset.pattern.permute.xlu2 %v3108_v41  ;;  %1620 = vset.pattern.permute.xlu1 %v3144_v26  ;;  %v3236_v41 = vld [vmem:[#allocation85_spill] sm:$0xff] }
 0x2ac   :  { %v2905_v27 = vadd.f32 %v1298_v59, %v1218_v17  ;;  %1375 = vperm.xlu2 %1621, %v2743_v7   ;;  %1471 = vperm.xlu1 %1620, %v1640_v13   ;;  %v1221_v2 = vadd.f32 %v3236_v41, %v1141_v36  ;;  %v1134_v13 = vmul.f32 %v3237_v21, %v2331_v25 }
 0x2ae   :  { %v1214_v9 = vadd.f32 %v2805_v15, %v1134_v13 }
 0x2b0   :  { %v1244_v0 = vpop.permute.xlu1 %1243 }
 0x2b1   :  { %v1291_v53 = vmul.f32 %v1244_v0, %v2334_v1  ;;  %v1284_v63 = vpop.permute.xlu2 %1283 }
 0x2b2   :  { %v1301_v32 = vmul.f32 %v1284_v63, %v2334_v1 }
 0x2b3   :  { %v1307_v8 = vadd.f32 %v1291_v53, %v1211_v61 }
 0x2b4   :  { %v2916_v45 = vadd.f32 %v1301_v32, %v1221_v2  ;;  %1379 = vperm.xlu2 %1621, %v2751_v5   ;;  %1475 = vperm.xlu1 %1620, %v2720_v20   ;;  %v3238_v20 = vld [vmem:[#allocation46_spill] sm:$0xff]  ;;  %v3241_v2 = vld [vmem:[#allocation93_spill] sm:$0xff] }
 0x2b5   :  { %v1137_v43 = vmul.f32 %v3238_v20, %v2331_v25 }
 0x2b7   :  { %v1217_v15 = vadd.f32 %v2821_v56, %v1137_v43  ;;  %v1320_v56 = vpop.permute.xlu0 %1319 }
 0x2b8   :  { %v1256_v44 = vpop.permute.xlu1 %1255  ;;  %v1382_v52 = vmul.f32 %v1320_v56, %v2370_v11 }
 0x2b9   :  { %v1294_v31 = vmul.f32 %v1256_v44, %v2334_v1 }
 0x2ba   :  { %v1328_v14 = vpop.permute.xlu2 %1327 }
 0x2bb   :  { %v2924_v10 = vadd.f32 %v1294_v31, %v1214_v9 }
 0x2bc   :  { %1623 = vset.pattern.permute.xlu2 %v3144_v26  ;;  %1483 = vperm.xlu1 %1620, %v1641_v37   ;;  %v3239_v26 = vld [vmem:[#allocation49_spill] sm:$0xff] }
 0x2bd   :  { %1487 = vperm.xlu2 %1623, %v2743_v7   ;;  %v1140_v48 = vmul.f32 %v3239_v26, %v2331_v25 }
 0x2bf   :  { %v1220_v49 = vadd.f32 %v2832_v29, %v1140_v48  ;;  %v1384_v29 = vmul.f32 %v1328_v14, %v2370_v11 }
 0x2c0   :  { %v1268_v58 = vpop.permute.xlu1 %1267 }
 0x2c1   :  { %v1297_v24 = vmul.f32 %v1268_v58, %v2334_v1  ;;  %v1400_v36 = vadd.f32 %v1384_v29, %v2827_v6 }
 0x2c2   :  { %v1336_v60 = vpop.permute.xlu2 %1335 }
 0x2c3   :  { %v2935_v28 = vadd.f32 %v1297_v24, %v1217_v15  ;;  %v1386_v35 = vmul.f32 %v1336_v60, %v2370_v11  ;;  %v1416_v61 = vmax.f32 %v1400_v36, 0.0  ;;  %v1352_v24 = vpop.permute.xlu0 %1351 }
 0x2c4   :  { %1491 = vperm.xlu1 %1620, %v2751_v5   ;;  %v1398_v5 = vadd.f32 %v1382_v52, %v1302_v34 }
 0x2c5   :  { %v1402_v34 = vadd.f32 %v1386_v35, %v2867_v12 }
 0x2c6   :  { %v1414_v25 = vmax.f32 %v1398_v5, 0.0 }
 0x2c7   :  { %v1418_v21 = vmax.f32 %v1402_v34, 0.0 }
 0x2c8   :  { %v1280_v40 = vpop.permute.xlu1 %1279  ;;  %v1494_v17 = vmul.f32 %v3240_v22, %v1414_v25 }
 0x2c9   :  { %v1300_v7 = vmul.f32 %v1280_v40, %v2334_v1 }
 0x2ca   :  { %v1340_v23 = vpop.permute.xlu2 %1339 }
 0x2cb   :  { %v2942_v4 = vadd.f32 %v1300_v7, %v1220_v49  ;;  %v1387_v6 = vmul.f32 %v1340_v23, %v2370_v11  ;;  %v1390_v49 = vmul.f32 %v1352_v24, %v2370_v11 }
 0x2d1   :  { %v1324_v47 = vpop.permute.xlu1 %1323 }
 0x2d2   :  { %v1344_v33 = vpop.permute.xlu2 %1343  ;;  %v1383_v42 = vmul.f32 %v1324_v47, %v2370_v11 }
 0x2d3   :  { %v1388_v20 = vmul.f32 %v1344_v33, %v2370_v11 }
 0x2d4   :  { %v1399_v38 = vadd.f32 %v1383_v42, %v2855_v62  ;;  %v3242_v42 = vld [vmem:[#allocation83_spill] sm:$0xff] }
 0x2d5   :  { %v1404_v26 = vadd.f32 %v1388_v20, %v2883_v50 }
 0x2d6   :  { %v1415_v57 = vmax.f32 %v1399_v38, 0.0 }
 0x2d7   :  { %v1420_v47 = vmax.f32 %v1404_v26, 0.0 }
 0x2d9   :  { %v1332_v54 = vpop.permute.xlu1 %1331 }
 0x2da   :  { %v1385_v1 = vmul.f32 %v1332_v54, %v2370_v11 }
 0x2db   :  { %v1448_v46 = vpop.permute.xlu2 %1447 }
 0x2dc   :  { %v1401_v16 = vadd.f32 %v1385_v1, %v1305_v55  ;;  %v1498_v44 = vmul.f32 %v1448_v46, %v1418_v21  ;;  %v1403_v55 = vadd.f32 %v1387_v6, %v1307_v8  ;;  %v1406_v8 = vadd.f32 %v1390_v49, %v2924_v10 }
 0x2de   :  { %v1417_v62 = vmax.f32 %v1401_v16, 0.0  ;;  %v1419_v43 = vmax.f32 %v1403_v55, 0.0  ;;  %v1422_v5 = vmax.f32 %v1406_v8, 0.0  ;;  %v1372_v16 = vpop.permute.xlu0 %1371 }
 0x2e0   :  { %v1497_v32 = vmul.f32 %v3241_v2, %v1417_v62 }
 0x2e2   :  { %v1436_v18 = vpop.permute.xlu1 %1435 }
 0x2e3   :  { %v1495_v59 = vmul.f32 %v1436_v18, %v1415_v57 }
 0x2e4   :  { %v1356_v53 = vpop.permute.xlu2 %1355 }
 0x2e5   :  { %v1510_v0 = vadd.f32 %v1495_v59, %v1494_v17  ;;  %v1391_v7 = vmul.f32 %v1356_v53, %v2370_v11 }
 0x2e7   :  { %v1407_v33 = vadd.f32 %v1391_v7, %v2895_v3 }
 0x2ea   :  { %v1440_v63 = vpop.permute.xlu1 %1439 }
 0x2eb   :  { %v1496_v41 = vmul.f32 %v1440_v63, %v1416_v61 }
 0x2ec   :  { %v1360_v37 = vpop.permute.xlu2 %1359 }
 0x2ed   :  { %v1511_v13 = vadd.f32 %v1510_v0, %v1496_v41  ;;  %v1392_v22 = vmul.f32 %v1360_v37, %v2370_v11 }
 0x2ef   :  { %v1512_v9 = vadd.f32 %v1511_v13, %v1497_v32  ;;  %v1408_v17 = vadd.f32 %v1392_v22, %v2861_v19  ;;  %v1480_v32 = vpop.permute.xlu0 %1479  ;;  %v1395_v19 = vmul.f32 %v1372_v16, %v2370_v11 }
 0x2f1   :  { %v1513_v31 = vadd.f32 %v1512_v9, %v1498_v44  ;;  %v1424_v35 = vmax.f32 %v1408_v17, 0.0  ;;  %v1411_v6 = vadd.f32 %v1395_v19, %v2876_v39 }
 0x2f3   :  { %v1348_v14 = vpop.permute.xlu1 %1347  ;;  %v1427_v37 = vmax.f32 %v1411_v6, 0.0 }
 0x2f4   :  { %v1389_v12 = vmul.f32 %v1348_v14, %v2370_v11 }
 0x2f5   :  { %v1464_v60 = vpop.permute.xlu2 %1463 }
 0x2f6   :  { %v1405_v48 = vadd.f32 %v1389_v12, %v2848_v51  ;;  %v1502_v25 = vmul.f32 %v1464_v60, %v1422_v5  ;;  %v1423_v51 = vmax.f32 %v1407_v33, 0.0 }
 0x2f8   :  { %v1421_v23 = vmax.f32 %v1405_v48, 0.0 }
 0x2fa   :  { %v1501_v54 = vmul.f32 %v3242_v42, %v1421_v23 }
 0x2fc   :  { %v1452_v58 = vpop.permute.xlu1 %1451 }
 0x2fd   :  { %v1499_v15 = vmul.f32 %v1452_v58, %v1419_v43  ;;  %v1468_v50 = vpop.permute.xlu2 %1467 }
 0x2fe   :  { %v1503_v29 = vmul.f32 %v1468_v50, %v1423_v51 }
 0x2ff   :  { %v1514_v40 = vadd.f32 %v1513_v31, %v1499_v15 }
 0x304   :  { %v1456_v56 = vpop.permute.xlu1 %1455 }
 0x305   :  { %v1500_v52 = vmul.f32 %v1456_v56, %v1420_v47 }
 0x306   :  { %v1376_v59 = vpop.permute.xlu2 %1375 }
 0x307   :  { %v1515_v38 = vadd.f32 %v1514_v40, %v1500_v52  ;;  %v1396_v13 = vmul.f32 %v1376_v59, %v2370_v11 }
 0x309   :  { %v1516_v46 = vadd.f32 %v1515_v38, %v1501_v54  ;;  %v1412_v14 = vadd.f32 %v1396_v13, %v2942_v4  ;;  %v1546_v54 = vstv %s2988_s2 }
 0x30b   :  { %v1517_v1 = vadd.f32 %v1516_v46, %v1502_v25  ;;  %v1428_v12 = vmax.f32 %v1412_v14, 0.0 }
 0x30d   :  { %v1364_v57 = vpop.permute.xlu1 %1363  ;;  %v1518_v18 = vadd.f32 %v1517_v1, %v1503_v29 }
 0x30e   :  { %v1393_v3 = vmul.f32 %v1364_v57, %v2370_v11  ;;  %v1380_v63 = vpop.permute.xlu2 %1379 }
 0x310   :  { %v1409_v62 = vadd.f32 %v1393_v3, %v2935_v28 }
 0x312   :  { %v1425_v2 = vmax.f32 %v1409_v62, 0.0 }
 0x315   :  { %v1368_v10 = vpop.permute.xlu1 %1367 }
 0x316   :  { %v1394_v36 = vmul.f32 %v1368_v10, %v2370_v11 }
 0x317   :  { %v1488_v55 = vpop.permute.xlu2 %1487 }
 0x318   :  { %v1410_v61 = vadd.f32 %v1394_v36, %v2905_v27  ;;  %v1397_v27 = vmul.f32 %v1380_v63, %v2370_v11  ;;  %v1508_v15 = vmul.f32 %v1488_v55, %v1428_v12 }
 0x31a   :  { %v1426_v41 = vmax.f32 %v1410_v61, 0.0  ;;  %v1413_v58 = vadd.f32 %v1397_v27, %v2916_v45 }
 0x31c   :  { %v1506_v9 = vmul.f32 %v1480_v32, %v1426_v41  ;;  %v1429_v26 = vmax.f32 %v1413_v58, 0.0 }
 0x31e   :  { %v1472_v0 = vpop.permute.xlu1 %1471 }
 0x31f   :  { %v1504_v34 = vmul.f32 %v1472_v0, %v1424_v35 }
 0x321   :  { %v1519_v53 = vadd.f32 %v1518_v18, %v1504_v34 }
 0x326   :  { %v1476_v21 = vpop.permute.xlu1 %1475 }
 0x327   :  { %v1505_v44 = vmul.f32 %v1476_v21, %v1425_v2 }
 0x329   :  { %v1520_v31 = vadd.f32 %v1519_v53, %v1505_v44 }
 0x32b   :  { %v1521_v28 = vadd.f32 %v1520_v31, %v1506_v9 }
 0x32e   :  { %v1484_v20 = vpop.permute.xlu1 %1483 }
 0x32f   :  { %v1507_v43 = vmul.f32 %v1484_v20, %v1427_v37 }
 0x331   :  { %v1522_v24 = vadd.f32 %v1521_v28, %v1507_v43 }
 0x333   :  { %v1523_v60 = vadd.f32 %v1522_v24, %v1508_v15 }
 0x336   :  { %v1492_v48 = vpop.permute.xlu1 %1491 }
 0x337   :  { %v1509_v40 = vmul.f32 %v1492_v48, %v1429_v26 }
 0x339   :  { %v1524_v49 = vadd.f32 %v1523_v60, %v1509_v40 }
 0x33b   :  { %v1525_v39 = vrot.slane %v1524_v49, 4 }
 0x33d   :  { %v1526_v7 = vadd.f32 %v1525_v39, %v1524_v49 }
 0x33f   :  { %v1527_v4 = vrot.slane %v1526_v7, 2 }
 0x341   :  { %v1528_v23 = vadd.f32 %v1527_v4, %v1526_v7 }
 0x343   :  { %v1529_v8 = vrot.slane %v1528_v23, 1 }
 0x345   :  { %v1530_v11 = vadd.f32 %v1529_v8, %v1528_v23 }
 0x347   :  { %v1531_v47 = vadd.f32 %v1530_v11, %v2853_v30 }
 0x349   :  { %1536 = vrot.lane.b32.xlu2 %v1531_v47, %s1643_s18  ;;  %v1532_v56 = vsel %vm21_vm0, %v1531_v47, 0.0 }
 0x34a   :  { %1533 = vadd.xlane.f32.xlu0 %v1532_v56 }
 0x3a3   :  { %v1537_v45 = vpop.permute.xlu2 %1536 }
 0x3a4   :  { %v1539_v33 = vsel %vm21_vm0, %v1537_v45, 0.0 }
 0x3a5   :  { %1540 = vadd.xlane.f32.xlu1 %v1539_v33 }
 0x3bd   :  { %v1534_v52 = vpop.xlane.xlu0 %1533 }
 0x418   :  { %v1541_v42 = vpop.xlane.xlu1 %1540 }
 0x419   :  { %v1543_v5 = vsel %vm1542_vm1, %v1534_v52, %v1541_v42 }
 0x41a   :  { %v1544_v38 = vmul.f32 0.015625, %v1543_v5 }
 0x41c   :  { %v1547_v50 = vadd.f32 %v1546_v54, %v1544_v38 }
 0x41e   :  { %v1573_v30 = vmul.f32 -1.442695, %v1547_v50 }
 0x420   :  { %1624 = vpow2.f32 %v1573_v30 }
 0x426   :  { %v1625_v25 = vpop.eup %1624 }
 0x427   :  { %v1551_v51 = vadd.f32 1.0, %v1625_v25 }
 0x429   :  { %1626 = vrcp.f32 %v1551_v51  ;;  %v1563_v57 = vand.u32 2147483648, %v1551_v51  ;;  %v1561_v22 = vand.u32 2147483647, %v1551_v51  ;;  %vm1557_vm3 = vweird.f32 %v1551_v51 }
 0x42b   :  { %v1564_v17 = vor.u32 1.1754944e-38, %v1563_v57  ;;  %vm1562_vm6 = vcmp.eq.f32.partialorder %v1561_v22, 8.507059e+37 }
 0x42f   :  { %v1627_v46 = vpop.eup %1626 }
 0x430   :  { %v1553_v29 = vmul.f32 %v1627_v46, %v1551_v51  ;;  %vm1558_vm2 = vweird.f32 %v1627_v46 }
 0x431   :  { %vm1559_vm5 = vmor %vm1557_vm3, %vm1558_vm2 }
 0x432   :  { %v1554_v1 = vsub.f32 1.0, %v1553_v29 }
 0x434   :  { %v1555_v18 = vmul.f32 %v1627_v46, %v1554_v1 }
 0x436   :  { %v1556_v10 = vadd.f32 %v1627_v46, %v1555_v18 }
 0x438   :  { %v1560_v59 = vsel %vm1559_vm5, %v1627_v46, %v1556_v10 }
 0x439   :  { %v1565_v3 = vsel %vm1562_vm6, %v1564_v17, %v1560_v59 }
 0x43a   :  { %1568 = vst.msk [vmem:[%s2989_s3] sm:$0x3] %vm1567_vm4, %v1565_v3 }

</bundles_post_ra>
